<compile_context>
chip_gen: v5e
topology: v5e:2x2
jax: 0.10.0
libtpu: 0.0.40
codegen_flags: <defaults>
</compile_context>

<pallas_src>
import jax
import jax.numpy as jnp
from jax.experimental import pallas as pl
from jax.experimental.pallas import tpu as pltpu


D_IN, D_H1, D_H2, D_OUT = 28 * 28, 512, 256, 10
D_OUT_PAD = 128   # lane-dense output stores; real logits are [:, :10]


def _round_up(x, m):
    return ((x + m - 1) // m) * m


def _choose_tm(B):
    """Batch tile size.

    - multiple of 8 (sublane aligned), capped at 512 rows,
    - single tile for tiny batches,
    - at least 2 grid steps once B >= 16 so v7x's two TensorCores both work.
    """
    tm = min(512, _round_up(B, 8))
    if B >= 16:
        tm = min(tm, _round_up((B + 1) // 2, 8))
    return tm


def mlp_kernel(x_ref, w1_ref, b1_ref, w2_ref, b2_ref, w3_ref, b3_ref, o_ref):
    # Cast activations to bf16 in-kernel (VPU filler), keep f32 accumulation.
    x = x_ref[...].astype(jnp.bfloat16)
    # Layer 1: (TM, 784)bf16 @ (784, 512)bf16 -> f32 acc, +bias, ReLU (f32)
    h1 = jnp.dot(x, w1_ref[...], preferred_element_type=jnp.float32)
    h1 = jnp.maximum(h1 + b1_ref[...], 0.0)
    # Layer 2: (TM, 512)bf16 @ (512, 256)bf16 -> f32 acc, +bias, ReLU (f32)
    h2 = jnp.dot(h1.astype(jnp.bfloat16), w2_ref[...],
                 preferred_element_type=jnp.float32)
    h2 = jnp.maximum(h2 + b2_ref[...], 0.0)
    # Layer 3: (TM, 256)bf16 @ (256, 128)bf16 -> f32 acc, +bias
    out = jnp.dot(h2.astype(jnp.bfloat16), w3_ref[...],
                  preferred_element_type=jnp.float32)
    o_ref[...] = (out + b3_ref[...]).astype(o_ref.dtype)


def prepare_params(params):
    """One-time weight/bias prep (bf16 cast, lane-padding of the logit dim).

    Run once at init and reuse; never re-run per forward call.
    Weights are stored (in, out) = transpose of PyTorch nn.Linear's (out, in).
    """
    w1, b1, w2, b2, w3, b3 = params
    w1p = w1.astype(jnp.bfloat16)                                   # (784, 512)
    w2p = w2.astype(jnp.bfloat16)                                   # (512, 256)
    w3p = jnp.pad(w3, ((0, 0), (0, D_OUT_PAD - D_OUT))).astype(jnp.bfloat16)
    b1p = b1.astype(jnp.float32).reshape(1, D_H1)
    b2p = b2.astype(jnp.float32).reshape(1, D_H2)
    b3p = jnp.pad(b3.reshape(1, D_OUT),
                  ((0, 0), (0, D_OUT_PAD - D_OUT))).astype(jnp.float32)
    return (w1p, b1p, w2p, b2p, w3p, b3p)


def dnn_forward(x_nchw, prepared_params, *, tm=None):
    """x_nchw: (B, 1, 28, 28) float32. Returns logits (B, 10) float32."""
    w1p, b1p, w2p, b2p, w3p, b3p = prepared_params
    B = x_nchw.shape[0]

    # Flatten exactly like nn.Flatten (keep batch dim, flatten the rest).
    x = x_nchw.reshape(B, -1).astype(jnp.float32)
    assert x.shape[1] == D_IN

    if tm is None:
        tm = _choose_tm(B)
    B_pad = _round_up(B, tm)
    grid = B_pad // tm

    # Only the batch dim is (conditionally) padded; no feature padding, no
    # wrapper-side dtype conversion of the activations.
    if B_pad != B:
        x = jnp.pad(x, ((0, B_pad - B), (0, 0)))

    # Weights/biases: constant block index -> VMEM-resident across batch tiles.
    const = lambda shape: pl.BlockSpec(shape, lambda i: (0,) * len(shape))

    flops = 2 * B_pad * (D_IN * D_H1 + D_H1 * D_H2 + D_H2 * D_OUT_PAD)
    weight_bytes = 2 * (D_IN * D_H1 + D_H1 * D_H2 + D_H2 * D_OUT_PAD) \
        + 4 * (D_H1 + D_H2 + D_OUT_PAD)
    bytes_accessed = B_pad * (D_IN * 4 + D_OUT_PAD * 4) + weight_bytes

    out = pl.pallas_call(
        mlp_kernel,
        out_shape=jax.ShapeDtypeStruct((B_pad, D_OUT_PAD), jnp.float32),
        grid=(grid,),
        in_specs=[
            # x tile: raw f32 rows; 784 spans the full last dim (layout-legal).
            pl.BlockSpec((tm, D_IN), lambda i: (i, 0)),
            const((D_IN, D_H1)), const((1, D_H1)),
            const((D_H1, D_H2)), const((1, D_H2)),
            const((D_H2, D_OUT_PAD)), const((1, D_OUT_PAD)),
        ],
        out_specs=pl.BlockSpec((tm, D_OUT_PAD), lambda i: (i, 0)),
        compiler_params=pltpu.CompilerParams(
            dimension_semantics=("parallel",),   # v7x: shard batch tiles over 2 TCs
            vmem_limit_bytes=16 << 20,
        ),
        cost_estimate=pl.CostEstimate(
            flops=flops, transcendentals=0, bytes_accessed=bytes_accessed),
    )(x, w1p, b1p, w2p, b2p, w3p, b3p)

    # Strip batch padding and the zero-padded logit columns.
    return out[:B, :D_OUT]


def init_params(key):
    """Deterministic init matching nn.Linear shapes (weights stored (in, out))."""
    ks = jax.random.split(key, 6)

    def linear(kw, kb, fan_in, fan_out):
        bound = 1.0 / jnp.sqrt(fan_in)
        # PyTorch nn.Linear weight is (out, in); we store its transpose (in, out).
        w = jax.random.uniform(kw, (fan_in, fan_out), jnp.float32, -bound, bound)
        b = jax.random.uniform(kb, (1, fan_out), jnp.float32, -bound, bound)
        return w, b

    w1, b1 = linear(ks[0], ks[1], D_IN, D_H1)
    w2, b2 = linear(ks[2], ks[3], D_H1, D_H2)
    w3, b3 = linear(ks[4], ks[5], D_H2, D_OUT)
    return (w1, b1, w2, b2, w3, b3)


if __name__ == "__main__":
    key = jax.random.PRNGKey(0)
    k_x, k_p = jax.random.split(key)

    B = 8  # small batch; at B >= 16 the grid gets >= 2 steps for v7x megacore
    x = jax.random.normal(k_x, (B, 1, 28, 28), jnp.float32)  # NCHW like PyTorch
    params = init_params(k_p)
    prepared = prepare_params(params)   # one-time weight prep (bf16, padding)

    logits = dnn_forward(x, prepared)
    jax.block_until_ready(logits)

    # Pure-JAX f32 reference of the original module (kernel runs matmuls in bf16,
    # so tolerance is relaxed accordingly).
    w1, b1, w2, b2, w3, b3 = params
    xf = x.reshape(B, -1)
    ref = jnp.maximum(xf @ w1 + b1, 0.0)
    ref = jnp.maximum(ref @ w2 + b2, 0.0)
    ref = ref @ w3 + b3
    assert logits.shape == (B, D_OUT)
    assert jnp.allclose(logits, ref, atol=5e-2, rtol=5e-2), (
        float(jnp.max(jnp.abs(logits - ref))))

    print("KERNEL_OK")
</pallas_src>

<mosaic_0001>
module attributes {stable_mosaic.version = 11 : i64} {
  func.func @mlp_kernel(%arg0: i32, %arg1: memref<8x784xf32, #tpu.memory_space<vmem>>, %arg2: memref<784x512xbf16, #tpu.memory_space<vmem>>, %arg3: memref<1x512xf32, #tpu.memory_space<vmem>>, %arg4: memref<512x256xbf16, #tpu.memory_space<vmem>>, %arg5: memref<1x256xf32, #tpu.memory_space<vmem>>, %arg6: memref<256x128xbf16, #tpu.memory_space<vmem>>, %arg7: memref<1x128xf32, #tpu.memory_space<vmem>>, %arg8: memref<8x128xf32, #tpu.memory_space<vmem>>) attributes {dimension_semantics = [#tpu.dimension_semantics<parallel>], iteration_bounds = array<i64: 1>, scalar_prefetch = 0 : i64, scratch_operands = 0 : i64, tpu.core_type = #tpu.core_type<tc>, window_params = [{transform_indices = @transform_0, window_bounds = array<i64: 8, 784>}, {pipeline_mode = #tpu.pipeline_mode<synchronous>, transform_indices = @transform_1, window_bounds = array<i64: 784, 512>}, {pipeline_mode = #tpu.pipeline_mode<synchronous>, transform_indices = @transform_2, window_bounds = array<i64: 1, 512>}, {pipeline_mode = #tpu.pipeline_mode<synchronous>, transform_indices = @transform_3, window_bounds = array<i64: 512, 256>}, {pipeline_mode = #tpu.pipeline_mode<synchronous>, transform_indices = @transform_4, window_bounds = array<i64: 1, 256>}, {pipeline_mode = #tpu.pipeline_mode<synchronous>, transform_indices = @transform_5, window_bounds = array<i64: 256, 128>}, {pipeline_mode = #tpu.pipeline_mode<synchronous>, transform_indices = @transform_6, window_bounds = array<i64: 1, 128>}, {transform_indices = @transform_7, window_bounds = array<i64: 8, 128>}]} {
    %c0 = arith.constant 0 : index
    %c0_0 = arith.constant 0 : index
    %0 = vector.load %arg1[%c0, %c0_0] : memref<8x784xf32, #tpu.memory_space<vmem>>, vector<8x784xf32>
    %1 = arith.truncf %0 : vector<8x784xf32> to vector<8x784xbf16>
    %c0_1 = arith.constant 0 : index
    %c0_2 = arith.constant 0 : index
    %2 = vector.load %arg2[%c0_1, %c0_2] : memref<784x512xbf16, #tpu.memory_space<vmem>>, vector<784x512xbf16>
    %cst = arith.constant dense<0.000000e+00> : vector<8x512xf32>
    %3 = tpu.matmul %1, %2, %cst {dimension_numbers = #tpu.dot_dimension_numbers<[1], [0], [0], [1], [0, 0, 1, 1], [], []>} : vector<8x784xbf16>, vector<784x512xbf16>, vector<8x512xf32> -> vector<8x512xf32>
    %c0_3 = arith.constant 0 : index
    %c0_4 = arith.constant 0 : index
    %4 = vector.load %arg3[%c0_3, %c0_4] : memref<1x512xf32, #tpu.memory_space<vmem>>, vector<1x512xf32>
    %5 = vector.broadcast %4 : vector<1x512xf32> to vector<8x512xf32>
    %6 = arith.addf %3, %5 : vector<8x512xf32>
    %cst_5 = arith.constant 0.000000e+00 : f32
    %7 = vector.broadcast %cst_5 : f32 to vector<8x512xf32>
    %8 = arith.maximumf %6, %7 : vector<8x512xf32>
    %9 = arith.truncf %8 : vector<8x512xf32> to vector<8x512xbf16>
    %c0_6 = arith.constant 0 : index
    %c0_7 = arith.constant 0 : index
    %10 = vector.load %arg4[%c0_6, %c0_7] : memref<512x256xbf16, #tpu.memory_space<vmem>>, vector<512x256xbf16>
    %cst_8 = arith.constant dense<0.000000e+00> : vector<8x256xf32>
    %11 = tpu.matmul %9, %10, %cst_8 {dimension_numbers = #tpu.dot_dimension_numbers<[1], [0], [0], [1], [0, 0, 1, 1], [], []>} : vector<8x512xbf16>, vector<512x256xbf16>, vector<8x256xf32> -> vector<8x256xf32>
    %c0_9 = arith.constant 0 : index
    %c0_10 = arith.constant 0 : index
    %12 = vector.load %arg5[%c0_9, %c0_10] : memref<1x256xf32, #tpu.memory_space<vmem>>, vector<1x256xf32>
    %13 = vector.broadcast %12 : vector<1x256xf32> to vector<8x256xf32>
    %14 = arith.addf %11, %13 : vector<8x256xf32>
    %cst_11 = arith.constant 0.000000e+00 : f32
    %15 = vector.broadcast %cst_11 : f32 to vector<8x256xf32>
    %16 = arith.maximumf %14, %15 : vector<8x256xf32>
    %17 = arith.truncf %16 : vector<8x256xf32> to vector<8x256xbf16>
    %c0_12 = arith.constant 0 : index
    %c0_13 = arith.constant 0 : index
    %18 = vector.load %arg6[%c0_12, %c0_13] : memref<256x128xbf16, #tpu.memory_space<vmem>>, vector<256x128xbf16>
    %cst_14 = arith.constant dense<0.000000e+00> : vector<8x128xf32>
    %19 = tpu.matmul %17, %18, %cst_14 {dimension_numbers = #tpu.dot_dimension_numbers<[1], [0], [0], [1], [0, 0, 1, 1], [], []>} : vector<8x256xbf16>, vector<256x128xbf16>, vector<8x128xf32> -> vector<8x128xf32>
    %c0_15 = arith.constant 0 : index
    %c0_16 = arith.constant 0 : index
    %20 = vector.load %arg7[%c0_15, %c0_16] : memref<1x128xf32, #tpu.memory_space<vmem>>, vector<1x128xf32>
    %21 = vector.broadcast %20 : vector<1x128xf32> to vector<8x128xf32>
    %22 = arith.addf %19, %21 : vector<8x128xf32>
    %c0_17 = arith.constant 0 : index
    %c0_18 = arith.constant 0 : index
    %23 = vector.load %arg8[%c0_17, %c0_18] : memref<8x128xf32, #tpu.memory_space<vmem>>, vector<8x128xf32>
    tpu.vector_store %arg8[%c0_17, %c0_18], %22 {strides = array<i32>} : memref<8x128xf32, #tpu.memory_space<vmem>>, vector<8x128xf32>,
    return
  }
  func.func @transform_0(%arg0: i32) -> (i32, i32) {
    %c0_i32 = arith.constant 0 : i32
    %c0_i32_0 = arith.constant 0 : i32
    return %arg0, %c0_i32 : i32, i32
  }
  func.func @transform_1(%arg0: i32) -> (i32, i32) {
    %c0_i32 = arith.constant 0 : i32
    %c0_i32_0 = arith.constant 0 : i32
    %c0_i32_1 = arith.constant 0 : i32
    return %c0_i32, %c0_i32_0 : i32, i32
  }
  func.func @transform_2(%arg0: i32) -> (i32, i32) {
    %c0_i32 = arith.constant 0 : i32
    %c0_i32_0 = arith.constant 0 : i32
    %c0_i32_1 = arith.constant 0 : i32
    return %c0_i32, %c0_i32_0 : i32, i32
  }
  func.func @transform_3(%arg0: i32) -> (i32, i32) {
    %c0_i32 = arith.constant 0 : i32
    %c0_i32_0 = arith.constant 0 : i32
    %c0_i32_1 = arith.constant 0 : i32
    return %c0_i32, %c0_i32_0 : i32, i32
  }
  func.func @transform_4(%arg0: i32) -> (i32, i32) {
    %c0_i32 = arith.constant 0 : i32
    %c0_i32_0 = arith.constant 0 : i32
    %c0_i32_1 = arith.constant 0 : i32
    return %c0_i32, %c0_i32_0 : i32, i32
  }
  func.func @transform_5(%arg0: i32) -> (i32, i32) {
    %c0_i32 = arith.constant 0 : i32
    %c0_i32_0 = arith.constant 0 : i32
    %c0_i32_1 = arith.constant 0 : i32
    return %c0_i32, %c0_i32_0 : i32, i32
  }
  func.func @transform_6(%arg0: i32) -> (i32, i32) {
    %c0_i32 = arith.constant 0 : i32
    %c0_i32_0 = arith.constant 0 : i32
    %c0_i32_1 = arith.constant 0 : i32
    return %c0_i32, %c0_i32_0 : i32, i32
  }
  func.func @transform_7(%arg0: i32) -> (i32, i32) {
    %c0_i32 = arith.constant 0 : i32
    %c0_i32_0 = arith.constant 0 : i32
    return %arg0, %c0_i32 : i32, i32
  }
}

</mosaic_0001>

<bundles_post_ra>
// kernel: tpu_custom_call.1
= control target key start
LH: loop header
LB: loop body
LE: loop exit
PB: predicated region body
PF: predicated region fallthrough
CT: control target
= control target key end

     0   :  { %12 = vsyncpa [#allocation3], 0  ;;  %s4047_s0 = inlined_call_operand.hbm [shape: f32[8,784], index: 0, kind: input, shape index: {}]   ;;  %s4048_s1 = inlined_call_operand.hbm [shape: bf16[784,512], index: 1, kind: input, shape index: {}]   ;;  %s4049_s2 = inlined_call_operand.hbm [shape: f32[1,512], index: 2, kind: input, shape index: {}]   ;;  %s4050_s3 = inlined_call_operand.hbm [shape: bf16[512,256], index: 3, kind: input, shape index: {}]   ;;  %s4051_s4 = inlined_call_operand.vmem [shape: f32[1,256], index: 4, kind: input, shape index: {}]   ;;  %s4052_s5 = inlined_call_operand.hbm [shape: bf16[256,128], index: 5, kind: input, shape index: {}]   ;;  %s4053_s6 = inlined_call_operand.vmem [shape: f32[1,128], index: 6, kind: input, shape index: {}]   ;;  %s4054_s7 = inlined_call_operand.hbm [shape: f32[8,128], index: 7, kind: output, shape index: {}]  }
   0x1   :  { %13 = vsyncpa [#allocation6], 0 }
   0x2   :  { %14 = vsyncpa [#allocation9], 0  ;;  %s31_s26 = sshll.u32 %s4048_s1, 4  ;;  %s32_s26 = int_to_ptr.hbm [resolvable:$true] %s31_s26 }
   0x3   :  { %15 = vsyncpa [#allocation4], 0  ;;  %s3903_s27 = smov [#allocation5]   ;;  %s55_s8 = sshll.u32 %s4050_s3, 4  ;;  %s56_s8 = int_to_ptr.hbm [resolvable:$true] %s55_s8 }
   0x4   :  { %s33_s28 = sshll.u32 %s3903_s27, 4  ;;  %s3904_s9 = smov 256   ;;  %s34_s28 = int_to_ptr.vmem [resolvable:$true] %s33_s28 }
   0x5   :  { %s3905_s10 = smov 16   ;;  %s3906_s11 = smov [#allocation8]  }
   0x6   :  { %39 = dma.hbm_to_vmem [thread:$0]  %s32_s26, 25088, %s34_s28, [#allocation6], %s3904_s9, %s3904_s9, %s3905_s10  }
   0x7   :  { %s57_s12 = sshll.u32 %s3906_s11, 4  ;;  %s3907_s13 = smov 128   ;;  %s58_s12 = int_to_ptr.vmem [resolvable:$true] %s57_s12 }
   0x8   :  { %s3908_s14 = smov 8   ;;  %s21_s16 = sshll.u32 %s4047_s0, 4  ;;  %s22_s16 = int_to_ptr.hbm [resolvable:$true] %s21_s16 }
   0x9   :  { %63 = dma.hbm_to_vmem [thread:$0]  %s56_s8, 8192, %s58_s12, [#allocation9], %s3907_s13, %s3907_s13, %s3908_s14  }
   0xa   :  { %s3909_s17 = smov [#allocation2]   ;;  %s45_s20 = sshll.u32 %s4049_s2, 4  ;;  %s46_s20 = int_to_ptr.hbm [resolvable:$true] %s45_s20 }
   0xb   :  { %s23_s18 = sshll.u32 %s3909_s17, 4  ;;  %s3910_s21 = smov [#allocation7]   ;;  %s24_s18 = int_to_ptr.vmem [resolvable:$true] %s23_s18 }
   0xc   :  { %26 = dma.hbm_to_vmem [thread:$0]  %s22_s16, 896, %s24_s18, [#allocation3]  }
   0xd   :  { %s47_s22 = sshll.u32 %s3910_s21, 4  ;;  %s70_s25 = sshll.u32 %s4052_s5, 4  ;;  %s48_s22 = int_to_ptr.vmem [resolvable:$true] %s47_s22  ;;  %s71_s25 = int_to_ptr.hbm [resolvable:$true] %s70_s25 }
   0xe   :  { %50 = dma.hbm_to_vmem [thread:$0]  %s46_s20, 64, %s48_s22, [#allocation6]  }
   0xf   :  { %s3911_s0 = smov [#allocation10]   ;;  %s3912_s27 = smov 64  }
  0x10   :  { %s72_s26 = sshll.u32 %s3911_s0, 4  ;;  %s3913_s28 = smov 4   ;;  %s73_s26 = int_to_ptr.vmem [resolvable:$true] %s72_s26 }
  0x11   :  { %78 = dma.hbm_to_vmem [thread:$0]  %s71_s25, 2048, %s73_s26, [#allocation9], %s3912_s27, %s3912_s27, %s3913_s28  }
  0x12   :  { %3895 = dma.done.wait [#allocation3], 896  }
  0x13   :  { %3896 = vsyncadd [#allocation3], 4294966400 }
  0x14   :  { %3897 = dma.done.wait [#allocation6], 25152  }
  0x15   :  { %3898 = vsyncadd [#allocation6], 4294942144 }
  0x16   :  { %3899 = dma.done.wait [#allocation9], 10240  }
  0x17   :  { %3900 = vsyncadd [#allocation9], 4294957056  ;;  %v2468_v0 = vld [vmem:[#allocation5 + $0xe0] sm:$0xf]  ;;  %v3492_v1 = vld [vmem:[#allocation5 + $0xec] sm:$0xf0] }
  0x18   :  { %v2596_v2 = vld [vmem:[#allocation5 + $0x1e0] sm:$0xf]  ;;  %v2469_v3 = vor.u32 %v3492_v1, %v2468_v0  ;;  %v3524_v4 = vld [vmem:[#allocation5 + $0x1ec] sm:$0xf0]  ;;  %vm1302_vm0 = vcmask 130048   ;;  %s3914_s30 = smov [#allocation11]  }
  0x19   :  { %v2724_v5 = vld [vmem:[#allocation5 + $0x2e0] sm:$0xf]  ;;  %v3556_v6 = vld [vmem:[#allocation5 + $0x2ec] sm:$0xf0]  ;;  %v2597_v7 = vor.u32 %v3524_v4, %v2596_v2  ;;  %s2340_s8 = sshll.u32 %s3914_s30, 4  ;;  %s2342_s11 = sshll.u32 %s4054_s7, 4  ;;  %s2341_s8 = int_to_ptr.vmem [resolvable:$true] %s2340_s8  ;;  %s2343_s11 = int_to_ptr.hbm [resolvable:$true] %s2342_s11 }
  0x1a   :  { %v2725_v8 = vor.u32 %v3556_v6, %v2724_v5  ;;  %v2852_v9 = vld [vmem:[#allocation5 + $0x3e0] sm:$0xf]  ;;  %v3588_v10 = vld [vmem:[#allocation5 + $0x3ec] sm:$0xf0]  ;;  %1306 = vmatpush.bf16.msra.mxu0 %v2469_v3 }
  0x1b   :  { %v2452_v11 = vld [vmem:[#allocation5 + $0xc0] sm:$0xf]  ;;  %v2853_v12 = vor.u32 %v3588_v10, %v2852_v9  ;;  %v3488_v13 = vld [vmem:[#allocation5 + $0xcc] sm:$0xf0]  ;;  %1319 = vmatpush.bf16.msra.mxu1 %v2597_v7 }
  0x1c   :  { %v2580_v14 = vld [vmem:[#allocation5 + $0x1c0] sm:$0xf]  ;;  %v3520_v15 = vld [vmem:[#allocation5 + $0x1cc] sm:$0xf0]  ;;  %1332 = vmatpush.bf16.msra.mxu2 %v2725_v8  ;;  %v2453_v16 = vor.u32 %v3488_v13, %v2452_v11 }
  0x1d   :  { %v2581_v17 = vor.u32 %v3520_v15, %v2580_v14  ;;  %v2708_v18 = vld [vmem:[#allocation5 + $0x2c0] sm:$0xf]  ;;  %v3552_v19 = vld [vmem:[#allocation5 + $0x2cc] sm:$0xf0]  ;;  %1345 = vmatpush.bf16.msra.mxu3 %v2853_v12 }
  0x1e   :  { %v2836_v20 = vld [vmem:[#allocation5 + $0x3c0] sm:$0xf]  ;;  %v2709_v21 = vor.u32 %v3552_v19, %v2708_v18  ;;  %v3584_v22 = vld [vmem:[#allocation5 + $0x3cc] sm:$0xf0]  ;;  %1307 = vmatpush.bf16.msra.mxu0 %v2453_v16 }
  0x1f   :  { %v2436_v23 = vld [vmem:[#allocation5 + $0xa0] sm:$0xf]  ;;  %v3484_v24 = vld [vmem:[#allocation5 + $0xac] sm:$0xf0]  ;;  %v2837_v25 = vor.u32 %v3584_v22, %v2836_v20  ;;  %1320 = vmatpush.bf16.msra.mxu1 %v2581_v17 }
  0x20   :  { %v2564_v26 = vld [vmem:[#allocation5 + $0x1a0] sm:$0xf]  ;;  %v3516_v27 = vld [vmem:[#allocation5 + $0x1ac] sm:$0xf0]  ;;  %v2437_v29 = vor.u32 %v3484_v24, %v2436_v23  ;;  %1333 = vmatpush.bf16.msra.mxu2 %v2709_v21 }
  0x21   :  { %v2692_v28 = vld [vmem:[#allocation5 + $0x2a0] sm:$0xf]  ;;  %v3548_v30 = vld [vmem:[#allocation5 + $0x2ac] sm:$0xf0]  ;;  %v2565_v33 = vor.u32 %v3516_v27, %v2564_v26  ;;  %1346 = vmatpush.bf16.msra.mxu3 %v2837_v25 }
  0x22   :  { %v2820_v31 = vld [vmem:[#allocation5 + $0x3a0] sm:$0xf]  ;;  %v3580_v32 = vld [vmem:[#allocation5 + $0x3ac] sm:$0xf0]  ;;  %v2693_v34 = vor.u32 %v3548_v30, %v2692_v28  ;;  %1308 = vmatpush.bf16.msra.mxu0 %v2437_v29 }
  0x23   :  { %v2420_v35 = vld [vmem:[#allocation5 + $0x80] sm:$0xf]  ;;  %v3480_v36 = vld [vmem:[#allocation5 + $0x8c] sm:$0xf0]  ;;  %v2821_v38 = vor.u32 %v3580_v32, %v2820_v31  ;;  %1321 = vmatpush.bf16.msra.mxu1 %v2565_v33  ;;  %v3490_v33 = vld [vmem:[#allocation5 + $0xe4] sm:$0xf] }
  0x24   :  { %v2548_v37 = vld [vmem:[#allocation5 + $0x180] sm:$0xf]  ;;  %v3512_v39 = vld [vmem:[#allocation5 + $0x18c] sm:$0xf0]  ;;  %v2421_v44 = vor.u32 %v3480_v36, %v2420_v35  ;;  %1334 = vmatpush.bf16.msra.mxu2 %v2693_v34  ;;  %v2470_v34 = vld [vmem:[#allocation5 + $0xf0] sm:$0xf0] }
  0x25   :  { %v2676_v40 = vld [vmem:[#allocation5 + $0x280] sm:$0xf]  ;;  %v3544_v41 = vld [vmem:[#allocation5 + $0x28c] sm:$0xf0]  ;;  %v2549_v45 = vor.u32 %v3512_v39, %v2548_v37  ;;  %1347 = vmatpush.bf16.msra.mxu3 %v2821_v38  ;;  %v104_v35 = vld [vmem:[#allocation2 + $0x10] sm:$0xff] }
  0x26   :  { %v2804_v42 = vld [vmem:[#allocation5 + $0x380] sm:$0xf]  ;;  %v3576_v43 = vld [vmem:[#allocation5 + $0x38c] sm:$0xf0]  ;;  %v2677_v46 = vor.u32 %v3544_v41, %v2676_v40  ;;  %1309 = vmatpush.bf16.msra.mxu0 %v2421_v44  ;;  %v102_v40 = vld [vmem:[#allocation2] sm:$0xff] }
  0x27   :  { %v2404_v47 = vld [vmem:[#allocation5 + $0x60] sm:$0xf]  ;;  %v3476_v48 = vld [vmem:[#allocation5 + $0x6c] sm:$0xf0]  ;;  %v2805_v50 = vor.u32 %v3576_v43, %v2804_v42  ;;  %1322 = vmatpush.bf16.msra.mxu1 %v2549_v45  ;;  %v3522_v43 = vld [vmem:[#allocation5 + $0x1e4] sm:$0xf] }
  0x28   :  { %v2532_v49 = vld [vmem:[#allocation5 + $0x160] sm:$0xf]  ;;  %v3508_v51 = vld [vmem:[#allocation5 + $0x16c] sm:$0xf0]  ;;  %v2405_v56 = vor.u32 %v3476_v48, %v2404_v47  ;;  %1335 = vmatpush.bf16.msra.mxu2 %v2677_v46  ;;  %v2598_v44 = vld [vmem:[#allocation5 + $0x1f0] sm:$0xf0]  ;;  %v2473_v47 = vor.u32 %v3490_v33, %v2470_v34 }
  0x29   :  { %v2660_v52 = vld [vmem:[#allocation5 + $0x260] sm:$0xf]  ;;  %v3540_v53 = vld [vmem:[#allocation5 + $0x26c] sm:$0xf0]  ;;  %v2533_v57 = vor.u32 %v3508_v51, %v2532_v49  ;;  %1348 = vmatpush.bf16.msra.mxu3 %v2805_v50  ;;  %v3970_v51 = vpack.c.bf16 %v104_v35, %v104_v35  ;;  %v3506_v35 = vld [vmem:[#allocation5 + $0x164] sm:$0xf] }
  0x2a   :  { %v2788_v54 = vld [vmem:[#allocation5 + $0x360] sm:$0xf]  ;;  %v3572_v55 = vld [vmem:[#allocation5 + $0x36c] sm:$0xf0]  ;;  %v2661_v58 = vor.u32 %v3540_v53, %v2660_v52  ;;  %1310 = vmatpush.bf16.msra.mxu0 %v2405_v56  ;;  %v3486_v53 = vld [vmem:[#allocation5 + $0xc4] sm:$0xf] }
  0x2b   :  { %v2388_v59 = vld [vmem:[#allocation5 + $0x40] sm:$0xf]  ;;  %v3472_v60 = vld [vmem:[#allocation5 + $0x4c] sm:$0xf0]  ;;  %v2789_v62 = vor.u32 %v3572_v55, %v2788_v54  ;;  %1323 = vmatpush.bf16.msra.mxu1 %v2533_v57  ;;  %v2454_v54 = vld [vmem:[#allocation5 + $0xd0] sm:$0xf0]  ;;  %v3972_v55 = vpack.c.bf16 %v102_v40, %v102_v40 }
  0x2c   :  { %v2516_v61 = vld [vmem:[#allocation5 + $0x140] sm:$0xf]  ;;  %v3504_v63 = vld [vmem:[#allocation5 + $0x14c] sm:$0xf0]  ;;  %v2389_v4 = vor.u32 %v3472_v60, %v2388_v59  ;;  %1336 = vmatpush.bf16.msra.mxu2 %v2661_v58  ;;  %v2601_v59 = vor.u32 %v3522_v43, %v2598_v44  ;;  %v3470_v43 = vld [vmem:[#allocation5 + $0x44] sm:$0xf] }
  0x2d   :  { %v2644_v0 = vld [vmem:[#allocation5 + $0x240] sm:$0xf]  ;;  %v3536_v1 = vld [vmem:[#allocation5 + $0x24c] sm:$0xf0]  ;;  %v2517_v5 = vor.u32 %v3504_v63, %v2516_v61  ;;  %1349 = vmatpush.bf16.msra.mxu3 %v2789_v62  ;;  %v3518_v61 = vld [vmem:[#allocation5 + $0x1c4] sm:$0xf] }
  0x2e   :  { %v2772_v2 = vld [vmem:[#allocation5 + $0x340] sm:$0xf]  ;;  %v3568_v3 = vld [vmem:[#allocation5 + $0x34c] sm:$0xf0]  ;;  %v2645_v6 = vor.u32 %v3536_v1, %v2644_v0  ;;  %1311 = vmatpush.bf16.msra.mxu0 %v2389_v4  ;;  %v2582_v62 = vld [vmem:[#allocation5 + $0x1d0] sm:$0xf0]  ;;  %v2457_v0 = vor.u32 %v3486_v53, %v2454_v54 }
  0x2f   :  { %v2372_v7 = vld [vmem:[#allocation5 + $0x20] sm:$0xf]  ;;  %v3468_v8 = vld [vmem:[#allocation5 + $0x2c] sm:$0xf0]  ;;  %v2773_v10 = vor.u32 %v3568_v3, %v2772_v2  ;;  %1324 = vmatpush.bf16.msra.mxu1 %v2517_v5  ;;  %v2390_v44 = vld [vmem:[#allocation5 + $0x50] sm:$0xf0] }
  0x30   :  { %v2500_v9 = vld [vmem:[#allocation5 + $0x120] sm:$0xf]  ;;  %v3500_v11 = vld [vmem:[#allocation5 + $0x12c] sm:$0xf0]  ;;  %v2373_v16 = vor.u32 %v3468_v8, %v2372_v7  ;;  %1337 = vmatpush.bf16.msra.mxu2 %v2645_v6  ;;  %v3482_v6 = vld [vmem:[#allocation5 + $0xa4] sm:$0xf]  ;;  %v2585_v8 = vor.u32 %v3518_v61, %v2582_v62 }
  0x31   :  { %v2628_v12 = vld [vmem:[#allocation5 + $0x220] sm:$0xf]  ;;  %v3532_v13 = vld [vmem:[#allocation5 + $0x22c] sm:$0xf0]  ;;  %v2501_v20 = vor.u32 %v3500_v11, %v2500_v9  ;;  %1350 = vmatpush.bf16.msra.mxu3 %v2773_v10  ;;  %v2438_v7 = vld [vmem:[#allocation5 + $0xb0] sm:$0xf0] }
  0x32   :  { %v2756_v14 = vld [vmem:[#allocation5 + $0x320] sm:$0xf]  ;;  %v3564_v15 = vld [vmem:[#allocation5 + $0x32c] sm:$0xf0]  ;;  %v2629_v21 = vor.u32 %v3532_v13, %v2628_v12  ;;  %1312 = vmatpush.bf16.msra.mxu0 %v2373_v16  ;;  %v3514_v10 = vld [vmem:[#allocation5 + $0x1a4] sm:$0xf]  ;;  %v2441_v13 = vor.u32 %v3482_v6, %v2438_v7 }
  0x33   :  { %v2356_v17 = vld [vmem:[#allocation5] sm:$0xf]  ;;  %v3464_v18 = vld [vmem:[#allocation5 + $0xc] sm:$0xf0]  ;;  %v2757_v25 = vor.u32 %v3564_v15, %v2756_v14  ;;  %1325 = vmatpush.bf16.msra.mxu1 %v2501_v20  ;;  %v2566_v11 = vld [vmem:[#allocation5 + $0x1b0] sm:$0xf0] }
  0x34   :  { %v2484_v19 = vld [vmem:[#allocation5 + $0x100] sm:$0xf]  ;;  %v3496_v22 = vld [vmem:[#allocation5 + $0x10c] sm:$0xf0]  ;;  %v2357_v32 = vor.u32 %v3464_v18, %v2356_v17  ;;  %1338 = vmatpush.bf16.msra.mxu2 %v2629_v21  ;;  %v3478_v18 = vld [vmem:[#allocation5 + $0x84] sm:$0xf]  ;;  %v2569_v20 = vor.u32 %v3514_v10, %v2566_v11 }
  0x35   :  { %v2612_v23 = vld [vmem:[#allocation5 + $0x200] sm:$0xf]  ;;  %v3528_v24 = vld [vmem:[#allocation5 + $0x20c] sm:$0xf0]  ;;  %v2485_v36 = vor.u32 %v3496_v22, %v2484_v19  ;;  %1351 = vmatpush.bf16.msra.mxu3 %v2757_v25  ;;  %v2422_v19 = vld [vmem:[#allocation5 + $0x90] sm:$0xf0] }
  0x36   :  { %v2740_v26 = vld [vmem:[#allocation5 + $0x300] sm:$0xf]  ;;  %v3560_v27 = vld [vmem:[#allocation5 + $0x30c] sm:$0xf0]  ;;  %v2613_v37 = vor.u32 %v3528_v24, %v2612_v23  ;;  %1313 = vmatpush.bf16.msra.mxu0 %v2357_v32  ;;  %v3510_v22 = vld [vmem:[#allocation5 + $0x184] sm:$0xf]  ;;  %v2425_v25 = vor.u32 %v3478_v18, %v2422_v19 }
  0x37   :  { %v2980_v28 = vld [vmem:[#allocation5 + $0x4e0] sm:$0xf]  ;;  %v3620_v29 = vld [vmem:[#allocation5 + $0x4ec] sm:$0xf0]  ;;  %v2741_v41 = vor.u32 %v3560_v27, %v2740_v26  ;;  %1326 = vmatpush.bf16.msra.mxu1 %v2485_v36  ;;  %v2550_v23 = vld [vmem:[#allocation5 + $0x190] sm:$0xf0] }
  0x38   :  { %v3108_v30 = vld [vmem:[#allocation5 + $0x5e0] sm:$0xf]  ;;  %v3652_v31 = vld [vmem:[#allocation5 + $0x5ec] sm:$0xf0]  ;;  %v2981_v42 = vor.u32 %v3620_v29, %v2980_v28  ;;  %1339 = vmatpush.bf16.msra.mxu2 %v2613_v37  ;;  %v108_v32 = vld [vmem:[#allocation2 + $0x30] sm:$0xff]  ;;  %v2553_v33 = vor.u32 %v3510_v22, %v2550_v23 }
  0x39   :  { %v3124_v38 = vld [vmem:[#allocation5 + $0x600] sm:$0xf]  ;;  %v3656_v39 = vld [vmem:[#allocation5 + $0x60c] sm:$0xf0]  ;;  %v3109_v46 = vor.u32 %v3652_v31, %v3108_v30  ;;  %1352 = vmatpush.bf16.msra.mxu3 %v2741_v41  ;;  %1314 = vmatmul.bf16.vlgmr.msra.gmra.mxu0 %v3972_v55  ;;  %v3474_v30 = vld [vmem:[#allocation5 + $0x64] sm:$0xf] }
  0x3a   :  { %v105_v45 = vld [vmem:[#allocation2 + $0x18] sm:$0xff]  ;;  %v3616_v49 = vld [vmem:[#allocation5 + $0x4cc] sm:$0xf0]  ;;  %v3125_v56 = vor.u32 %v3656_v39, %v3124_v38  ;;  %1358 = vmatpush.bf16.msrb.mxu0 %v2981_v42  ;;  %v2406_v31 = vld [vmem:[#allocation5 + $0x70] sm:$0xf0] }
  0x3b   :  { %v2964_v48 = vld [vmem:[#allocation5 + $0x4c0] sm:$0xf]  ;;  %v3648_v52 = vld [vmem:[#allocation5 + $0x5cc] sm:$0xf0]  ;;  %v3974_v57 = vpack.c.bf16 %v105_v45, %v105_v45  ;;  %1371 = vmatpush.bf16.msrb.mxu1 %v3109_v46  ;;  %1340 = vmatmul.bf16.vlgmr.msra.gmra.mxu2 %v3970_v51  ;;  %v2534_v36 = vld [vmem:[#allocation5 + $0x170] sm:$0xf0]  ;;  %v2409_v38 = vor.u32 %v3474_v30, %v2406_v31  ;;  %v3982_v45 = vpack.c.bf16 %v108_v32, %v108_v32 }
  0x3c   :  { %v3092_v50 = vld [vmem:[#allocation5 + $0x5c0] sm:$0xf]  ;;  %v103_v58 = vld [vmem:[#allocation2 + $0x8] sm:$0xff]  ;;  %v2965_v60 = vor.u32 %v3616_v49, %v2964_v48  ;;  %1391 = vmatpush.bf16.msrb.mxu2 %v3125_v56  ;;  %v2537_v46 = vor.u32 %v3506_v35, %v2534_v36  ;;  %v3502_v48 = vld [vmem:[#allocation5 + $0x144] sm:$0xf] }
  0x3d   :  { %1397 = vmatpush.bf16.msrb.mxu3 %v2473_v47  ;;  %v3093_v63 = vor.u32 %v3648_v52, %v3092_v50  ;;  %v2948_v1 = vld [vmem:[#allocation5 + $0x4a0] sm:$0xf]  ;;  %v3612_v2 = vld [vmem:[#allocation5 + $0x4ac] sm:$0xf0]  ;;  %v3978_v4 = vpack.c.bf16 %v103_v58, %v103_v58  ;;  %v2518_v49 = vld [vmem:[#allocation5 + $0x150] sm:$0xf0]  ;;  %v2393_v52 = vor.u32 %v3470_v43, %v2390_v44 }
  0x3e   :  { %v3076_v3 = vld [vmem:[#allocation5 + $0x5a0] sm:$0xf]  ;;  %v3644_v5 = vld [vmem:[#allocation5 + $0x5ac] sm:$0xf0]  ;;  %1353 = vmatmul.bf16.vlgmr.msra.gmra.mxu3 %v3974_v57  ;;  %1359 = vmatpush.bf16.msrb.mxu0 %v2965_v60  ;;  %v2949_v9 = vor.u32 %v3612_v2, %v2948_v1  ;;  %v2374_v60 = vld [vmem:[#allocation5 + $0x30] sm:$0xf0]  ;;  %v2521_v61 = vor.u32 %v3502_v48, %v2518_v49 }
  0x3f   :  { %1372 = vmatpush.bf16.msrb.mxu1 %v3093_v63  ;;  %v3077_v12 = vor.u32 %v3644_v5, %v3076_v3  ;;  %v2932_v14 = vld [vmem:[#allocation5 + $0x480] sm:$0xf]  ;;  %v3608_v15 = vld [vmem:[#allocation5 + $0x48c] sm:$0xf0]  ;;  %v3498_v63 = vld [vmem:[#allocation5 + $0x124] sm:$0xf] }
  0x40   :  { %1410 = vmatpush.bf16.msra.mxu2 %v2601_v59  ;;  %v3060_v16 = vld [vmem:[#allocation5 + $0x580] sm:$0xf]  ;;  %1327 = vmatmul.bf16.vlgmr.msra.gmra.mxu1 %v3978_v4  ;;  %v3640_v17 = vld [vmem:[#allocation5 + $0x58c] sm:$0xf0]  ;;  %v2933_v21 = vor.u32 %v3608_v15, %v2932_v14  ;;  %v3466_v59 = vld [vmem:[#allocation5 + $0x24] sm:$0xf] }
  0x41   :  { %1398 = vmatpush.bf16.msrb.mxu3 %v2457_v0  ;;  %v3061_v24 = vor.u32 %v3640_v17, %v3060_v16  ;;  %v2916_v26 = vld [vmem:[#allocation5 + $0x460] sm:$0xf]  ;;  %v3604_v27 = vld [vmem:[#allocation5 + $0x46c] sm:$0xf0]  ;;  %v2502_v0 = vld [vmem:[#allocation5 + $0x130] sm:$0xf0]  ;;  %v2377_v3 = vor.u32 %v3466_v59, %v2374_v60 }
  0x42   :  { %1360 = vmatpush.bf16.msrb.mxu0 %v2949_v9  ;;  %v3044_v28 = vld [vmem:[#allocation5 + $0x560] sm:$0xf]  ;;  %v3636_v29 = vld [vmem:[#allocation5 + $0x56c] sm:$0xf0]  ;;  %v2917_v34 = vor.u32 %v3604_v27, %v2916_v26  ;;  %v2358_v9 = vld [vmem:[#allocation5 + $0x10] sm:$0xf0]  ;;  %v2505_v14 = vor.u32 %v3498_v63, %v2502_v0 }
  0x43   :  { %1373 = vmatpush.bf16.msrb.mxu1 %v3077_v12  ;;  %v3045_v37 = vor.u32 %v3636_v29, %v3044_v28  ;;  %v2900_v39 = vld [vmem:[#allocation5 + $0x440] sm:$0xf]  ;;  %v3600_v40 = vld [vmem:[#allocation5 + $0x44c] sm:$0xf0]  ;;  %v3554_v10 = vld [vmem:[#allocation5 + $0x2e4] sm:$0xf] }
  0x44   :  { %1411 = vmatpush.bf16.msra.mxu2 %v2585_v8  ;;  %v3028_v41 = vld [vmem:[#allocation5 + $0x540] sm:$0xf]  ;;  %v3632_v42 = vld [vmem:[#allocation5 + $0x54c] sm:$0xf0]  ;;  %v2901_v47 = vor.u32 %v3600_v40, %v2900_v39  ;;  %v3462_v8 = vld [vmem:[#allocation5 + $0x4] sm:$0xf] }
  0x45   :  { %1399 = vmatpush.bf16.msrb.mxu3 %v2441_v13  ;;  %v3029_v50 = vor.u32 %v3632_v42, %v3028_v41  ;;  %v2884_v53 = vld [vmem:[#allocation5 + $0x420] sm:$0xf]  ;;  %v3596_v54 = vld [vmem:[#allocation5 + $0x42c] sm:$0xf0]  ;;  %v2726_v11 = vld [vmem:[#allocation5 + $0x2f0] sm:$0xf0] }
  0x46   :  { %1361 = vmatpush.bf16.msrb.mxu0 %v2933_v21  ;;  %v3012_v56 = vld [vmem:[#allocation5 + $0x520] sm:$0xf]  ;;  %v3628_v58 = vld [vmem:[#allocation5 + $0x52c] sm:$0xf0]  ;;  %v2885_v62 = vor.u32 %v3596_v54, %v2884_v53  ;;  %v3586_v12 = vld [vmem:[#allocation5 + $0x3e4] sm:$0xf] }
  0x47   :  { %1374 = vmatpush.bf16.msrb.mxu1 %v3061_v24  ;;  %v2868_v1 = vld [vmem:[#allocation5 + $0x400] sm:$0xf]  ;;  %v3013_v2 = vor.u32 %v3628_v58, %v3012_v56  ;;  %v3592_v5 = vld [vmem:[#allocation5 + $0x40c] sm:$0xf0]  ;;  %v2854_v13 = vld [vmem:[#allocation5 + $0x3f0] sm:$0xf0]  ;;  %v2729_v24 = vor.u32 %v3554_v10, %v2726_v11 }
  0x48   :  { %1412 = vmatpush.bf16.msra.mxu2 %v2569_v20  ;;  %v2996_v6 = vld [vmem:[#allocation5 + $0x500] sm:$0xf]  ;;  %v3624_v7 = vld [vmem:[#allocation5 + $0x50c] sm:$0xf0]  ;;  %v2869_v15 = vor.u32 %v3592_v5, %v2868_v1  ;;  %v3618_v16 = vld [vmem:[#allocation5 + $0x4e4] sm:$0xf]  ;;  %v2361_v20 = vor.u32 %v3462_v8, %v2358_v9 }
  0x49   :  { %1400 = vmatpush.bf16.msrb.mxu3 %v2425_v25  ;;  %v2982_v17 = vld [vmem:[#allocation5 + $0x4f0] sm:$0xf0]  ;;  %v106_v18 = vld [vmem:[#allocation2 + $0x20] sm:$0xff]  ;;  %v2997_v19 = vor.u32 %v3624_v7, %v2996_v6  ;;  %v3494_v21 = vld [vmem:[#allocation5 + $0x104] sm:$0xf]  ;;  %v2857_v25 = vor.u32 %v3586_v12, %v2854_v13 }
  0x4a   :  { %1362 = vmatpush.bf16.msrb.mxu0 %v2917_v34  ;;  %v2486_v22 = vld [vmem:[#allocation5 + $0x110] sm:$0xf0]  ;;  %v3650_v26 = vld [vmem:[#allocation5 + $0x5e4] sm:$0xf]  ;;  %v2985_v29 = vor.u32 %v3618_v16, %v2982_v17  ;;  %v3986_v30 = vpack.c.bf16 %v106_v18, %v106_v18 }
  0x4b   :  { %1375 = vmatpush.bf16.msrb.mxu1 %v3045_v37  ;;  %3138 = vmatmul.msk.bf16.vlgmr.msrb.gmra.mxu2 %vm1302_vm0, %v3982_v45  ;;  %v107_v23 = vld [vmem:[#allocation2 + $0x28] sm:$0xff]  ;;  %v3550_v28 = vld [vmem:[#allocation5 + $0x2c4] sm:$0xf]  ;;  %v2489_v34 = vor.u32 %v3494_v21, %v2486_v22 }
  0x4c   :  { %1413 = vmatpush.bf16.msra.mxu2 %v2553_v33  ;;  %v3110_v27 = vld [vmem:[#allocation5 + $0x5f0] sm:$0xf0]  ;;  %v3582_v32 = vld [vmem:[#allocation5 + $0x3c4] sm:$0xf]  ;;  %v3988_v35 = vpack.c.bf16 %v107_v23, %v107_v23 }
  0x4d   :  { %1401 = vmatpush.bf16.msrb.mxu3 %v2409_v38  ;;  %v2710_v31 = vld [vmem:[#allocation5 + $0x2d0] sm:$0xf0]  ;;  %v3614_v36 = vld [vmem:[#allocation5 + $0x4c4] sm:$0xf]  ;;  %v3113_v38 = vor.u32 %v3650_v26, %v3110_v27 }
  0x4e   :  { %1363 = vmatpush.bf16.msrb.mxu0 %v2901_v47  ;;  %v2838_v33 = vld [vmem:[#allocation5 + $0x3d0] sm:$0xf0]  ;;  %v2713_v39 = vor.u32 %v3550_v28, %v2710_v31  ;;  %v3646_v41 = vld [vmem:[#allocation5 + $0x5c4] sm:$0xf] }
  0x4f   :  { %1376 = vmatpush.bf16.msrb.mxu1 %v3029_v50  ;;  %v2966_v37 = vld [vmem:[#allocation5 + $0x4d0] sm:$0xf0]  ;;  %v2841_v40 = vor.u32 %v3582_v32, %v2838_v33  ;;  %v3546_v43 = vld [vmem:[#allocation5 + $0x2a4] sm:$0xf] }
  0x50   :  { %1414 = vmatpush.bf16.msra.mxu2 %v2537_v46  ;;  %v3094_v42 = vld [vmem:[#allocation5 + $0x5d0] sm:$0xf0]  ;;  %v2969_v44 = vor.u32 %v3614_v36, %v2966_v37  ;;  %v3578_v47 = vld [vmem:[#allocation5 + $0x3a4] sm:$0xf] }
  0x51   :  { %1402 = vmatpush.bf16.msrb.mxu3 %v2393_v52  ;;  %v2694_v46 = vld [vmem:[#allocation5 + $0x2b0] sm:$0xf0]  ;;  %v3610_v49 = vld [vmem:[#allocation5 + $0x4a4] sm:$0xf]  ;;  %v3097_v52 = vor.u32 %v3646_v41, %v3094_v42 }
  0x52   :  { %1364 = vmatpush.bf16.msrb.mxu0 %v2885_v62  ;;  %v2822_v48 = vld [vmem:[#allocation5 + $0x3b0] sm:$0xf0]  ;;  %v2697_v53 = vor.u32 %v3546_v43, %v2694_v46  ;;  %v3642_v56 = vld [vmem:[#allocation5 + $0x5a4] sm:$0xf] }
  0x53   :  { %1377 = vmatpush.bf16.msrb.mxu1 %v3013_v2  ;;  %v2950_v50 = vld [vmem:[#allocation5 + $0x4b0] sm:$0xf0]  ;;  %v2825_v54 = vor.u32 %v3578_v47, %v2822_v48  ;;  %v3542_v59 = vld [vmem:[#allocation5 + $0x284] sm:$0xf] }
  0x54   :  { %1415 = vmatpush.bf16.msra.mxu2 %v2521_v61  ;;  %v3078_v58 = vld [vmem:[#allocation5 + $0x5b0] sm:$0xf0]  ;;  %v2953_v60 = vor.u32 %v3610_v49, %v2950_v50  ;;  %v3574_v62 = vld [vmem:[#allocation5 + $0x384] sm:$0xf] }
  0x55   :  { %1403 = vmatpush.bf16.msrb.mxu3 %v2377_v3  ;;  %v2678_v61 = vld [vmem:[#allocation5 + $0x290] sm:$0xf0]  ;;  %v3606_v0 = vld [vmem:[#allocation5 + $0x484] sm:$0xf]  ;;  %v3081_v2 = vor.u32 %v3642_v56, %v3078_v58  ;;  %v2476_v56 = vld [vmem:[#allocation5 + $0xe8] sm:$0xf] }
  0x56   :  { %1365 = vmatpush.bf16.msrb.mxu0 %v2869_v15  ;;  %v2806_v63 = vld [vmem:[#allocation5 + $0x390] sm:$0xf0]  ;;  %v2681_v3 = vor.u32 %v3542_v59, %v2678_v61  ;;  %v3638_v6 = vld [vmem:[#allocation5 + $0x584] sm:$0xf]  ;;  %v3493_v58 = vld [vmem:[#allocation5 + $0xf4] sm:$0xf0] }
  0x57   :  { %1378 = vmatpush.bf16.msrb.mxu1 %v2997_v19  ;;  %v2934_v1 = vld [vmem:[#allocation5 + $0x490] sm:$0xf0]  ;;  %v2809_v5 = vor.u32 %v3574_v62, %v2806_v63  ;;  %v3538_v8 = vld [vmem:[#allocation5 + $0x264] sm:$0xf]  ;;  %v2604_v59 = vld [vmem:[#allocation5 + $0x1e8] sm:$0xf] }
  0x58   :  { %1416 = vmatpush.bf16.msra.mxu2 %v2505_v14  ;;  %v3062_v7 = vld [vmem:[#allocation5 + $0x590] sm:$0xf0]  ;;  %v2937_v9 = vor.u32 %v3606_v0, %v2934_v1  ;;  %v3570_v11 = vld [vmem:[#allocation5 + $0x364] sm:$0xf]  ;;  %v3525_v61 = vld [vmem:[#allocation5 + $0x1f4] sm:$0xf0] }
  0x59   :  { %1404 = vmatpush.bf16.msrb.mxu3 %v2361_v20  ;;  %1366 = vmatmul.bf16.vlgmr.msrb.gmra.mxu0 %v3986_v30  ;;  %v2662_v10 = vld [vmem:[#allocation5 + $0x270] sm:$0xf0]  ;;  %v3602_v13 = vld [vmem:[#allocation5 + $0x464] sm:$0xf]  ;;  %v3065_v15 = vor.u32 %v3638_v6, %v3062_v7  ;;  %v2477_v6 = vor.u32 %v3493_v58, %v2476_v56  ;;  %v2860_v7 = vld [vmem:[#allocation5 + $0x3e8] sm:$0xf] }
  0x5a   :  { %1423 = vmatpush.bf16.msra.mxu0 %v2729_v24  ;;  %1379 = vmatmul.bf16.vlgmr.msrb.gmra.mxu1 %v3988_v35  ;;  %v2790_v12 = vld [vmem:[#allocation5 + $0x370] sm:$0xf0]  ;;  %v2665_v16 = vor.u32 %v3538_v8, %v2662_v10  ;;  %v3634_v18 = vld [vmem:[#allocation5 + $0x564] sm:$0xf]  ;;  %v3589_v8 = vld [vmem:[#allocation5 + $0x3f4] sm:$0xf0]  ;;  %v2605_v10 = vor.u32 %v3525_v61, %v2604_v59 }
  0x5b   :  { %1436 = vmatpush.bf16.msra.mxu1 %v2857_v25  ;;  %v2918_v14 = vld [vmem:[#allocation5 + $0x470] sm:$0xf0]  ;;  %v2793_v17 = vor.u32 %v3570_v11, %v2790_v12  ;;  %v3534_v20 = vld [vmem:[#allocation5 + $0x244] sm:$0xf]  ;;  %v3489_v11 = vld [vmem:[#allocation5 + $0xd4] sm:$0xf0] }
  0x5c   :  { %1417 = vmatpush.bf16.msra.mxu2 %v2489_v34  ;;  %1405 = vmatmul.bf16.vlgmr.msrb.gmra.mxu3 %v3972_v55  ;;  %v3046_v19 = vld [vmem:[#allocation5 + $0x570] sm:$0xf0]  ;;  %v2921_v21 = vor.u32 %v3602_v13, %v2918_v14  ;;  %v3566_v23 = vld [vmem:[#allocation5 + $0x344] sm:$0xf]  ;;  %v2732_v13 = vld [vmem:[#allocation5 + $0x2e8] sm:$0xf] }
  0x5d   :  { %1449 = vmatpush.bf16.msra.mxu3 %v2985_v29  ;;  %v2646_v22 = vld [vmem:[#allocation5 + $0x250] sm:$0xf0]  ;;  %v3598_v25 = vld [vmem:[#allocation5 + $0x444] sm:$0xf]  ;;  %v3049_v27 = vor.u32 %v3634_v18, %v3046_v19  ;;  %v3557_v14 = vld [vmem:[#allocation5 + $0x2f4] sm:$0xf0]  ;;  %v2861_v18 = vor.u32 %v3589_v8, %v2860_v7 }
  0x5e   :  { %1424 = vmatpush.bf16.msra.mxu0 %v2713_v39  ;;  %v2774_v24 = vld [vmem:[#allocation5 + $0x350] sm:$0xf0]  ;;  %v2649_v28 = vor.u32 %v3534_v20, %v2646_v22  ;;  %v3630_v31 = vld [vmem:[#allocation5 + $0x544] sm:$0xf]  ;;  %v2844_v20 = vld [vmem:[#allocation5 + $0x3c8] sm:$0xf] }
  0x5f   :  { %1437 = vmatpush.bf16.msra.mxu1 %v2841_v40  ;;  %1418 = vmatmul.bf16.vlgmr.msra.gmra.mxu2 %v3978_v4  ;;  %v2902_v26 = vld [vmem:[#allocation5 + $0x450] sm:$0xf0]  ;;  %v2777_v29 = vor.u32 %v3566_v23, %v2774_v24  ;;  %v3530_v33 = vld [vmem:[#allocation5 + $0x224] sm:$0xf]  ;;  %v2444_v22 = vld [vmem:[#allocation5 + $0xa8] sm:$0xf]  ;;  %v2733_v23 = vor.u32 %v3557_v14, %v2732_v13 }
  0x60   :  { %1462 = vmatpush.bf16.msrb.mxu2 %v3113_v38  ;;  %v3030_v32 = vld [vmem:[#allocation5 + $0x550] sm:$0xf0]  ;;  %v2905_v34 = vor.u32 %v3598_v25, %v2902_v26  ;;  %v3562_v37 = vld [vmem:[#allocation5 + $0x324] sm:$0xf]  ;;  %v3485_v25 = vld [vmem:[#allocation5 + $0xb4] sm:$0xf0] }
  0x61   :  { %1450 = vmatpush.bf16.msra.mxu3 %v2969_v44  ;;  %v2630_v36 = vld [vmem:[#allocation5 + $0x230] sm:$0xf0]  ;;  %v3594_v39 = vld [vmem:[#allocation5 + $0x424] sm:$0xf]  ;;  %v3033_v41 = vor.u32 %v3630_v31, %v3030_v32  ;;  %v2716_v26 = vld [vmem:[#allocation5 + $0x2c8] sm:$0xf]  ;;  %v2445_v32 = vor.u32 %v3485_v25, %v2444_v22 }
  0x62   :  { %1425 = vmatpush.bf16.msra.mxu0 %v2697_v53  ;;  %v2758_v38 = vld [vmem:[#allocation5 + $0x330] sm:$0xf0]  ;;  %v3626_v42 = vld [vmem:[#allocation5 + $0x524] sm:$0xf]  ;;  %v2633_v46 = vor.u32 %v3530_v33, %v2630_v36  ;;  %v2828_v33 = vld [vmem:[#allocation5 + $0x3a8] sm:$0xf] }
  0x63   :  { %1438 = vmatpush.bf16.msra.mxu1 %v2825_v54  ;;  %v2886_v40 = vld [vmem:[#allocation5 + $0x430] sm:$0xf0]  ;;  %v3526_v44 = vld [vmem:[#allocation5 + $0x204] sm:$0xf]  ;;  %v2761_v47 = vor.u32 %v3562_v37, %v2758_v38  ;;  %v2428_v36 = vld [vmem:[#allocation5 + $0x88] sm:$0xf] }
  0x64   :  { %1463 = vmatpush.bf16.msrb.mxu2 %v3097_v52  ;;  %v3014_v43 = vld [vmem:[#allocation5 + $0x530] sm:$0xf0]  ;;  %v3558_v49 = vld [vmem:[#allocation5 + $0x304] sm:$0xf]  ;;  %v2889_v52 = vor.u32 %v3594_v39, %v2886_v40  ;;  %v3481_v39 = vld [vmem:[#allocation5 + $0x94] sm:$0xf0] }
  0x65   :  { %1451 = vmatpush.bf16.msra.mxu3 %v2953_v60  ;;  %v2614_v48 = vld [vmem:[#allocation5 + $0x210] sm:$0xf0]  ;;  %v3590_v53 = vld [vmem:[#allocation5 + $0x404] sm:$0xf]  ;;  %v3017_v60 = vor.u32 %v3626_v42, %v3014_v43  ;;  %v2700_v40 = vld [vmem:[#allocation5 + $0x2a8] sm:$0xf] }
  0x66   :  { %1426 = vmatpush.bf16.msra.mxu0 %v2681_v3  ;;  %v2742_v50 = vld [vmem:[#allocation5 + $0x310] sm:$0xf0]  ;;  %v3654_v62 = vld [vmem:[#allocation5 + $0x604] sm:$0xf]  ;;  %v2617_v0 = vor.u32 %v3526_v44, %v2614_v48  ;;  %v2556_v42 = vld [vmem:[#allocation5 + $0x188] sm:$0xf] }
  0x67   :  { %1439 = vmatpush.bf16.msra.mxu1 %v2809_v5  ;;  %v2870_v54 = vld [vmem:[#allocation5 + $0x410] sm:$0xf0]  ;;  %v2745_v1 = vor.u32 %v3558_v49, %v2742_v50  ;;  %v3513_v43 = vld [vmem:[#allocation5 + $0x194] sm:$0xf0]  ;;  %v2412_v49 = vld [vmem:[#allocation5 + $0x68] sm:$0xf] }
  0x68   :  { %1464 = vmatpush.bf16.msrb.mxu2 %v3081_v2  ;;  %v3126_v63 = vld [vmem:[#allocation5 + $0x610] sm:$0xf0]  ;;  %v3622_v2 = vld [vmem:[#allocation5 + $0x504] sm:$0xf]  ;;  %v2873_v5 = vor.u32 %v3590_v53, %v2870_v54  ;;  %v3577_v48 = vld [vmem:[#allocation5 + $0x394] sm:$0xf0] }
  0x69   :  { %1452 = vmatpush.bf16.msra.mxu3 %v2937_v9  ;;  %v2998_v3 = vld [vmem:[#allocation5 + $0x510] sm:$0xf0]  ;;  %v2460_v9 = vld [vmem:[#allocation5 + $0xc8] sm:$0xf]  ;;  %v3129_v12 = vor.u32 %v3654_v62, %v3126_v63  ;;  %v3477_v53 = vld [vmem:[#allocation5 + $0x74] sm:$0xf0] }
  0x6a   :  { %1427 = vmatpush.bf16.msra.mxu0 %v2665_v16  ;;  %v2588_v16 = vld [vmem:[#allocation5 + $0x1c8] sm:$0xf]  ;;  %v2461_v19 = vor.u32 %v3489_v11, %v2460_v9  ;;  %v3545_v56 = vld [vmem:[#allocation5 + $0x294] sm:$0xf0]  ;;  %v2413_v61 = vor.u32 %v3477_v53, %v2412_v49 }
  0x6b   :  { %1440 = vmatpush.bf16.msra.mxu1 %v2793_v17  ;;  %v3521_v17 = vld [vmem:[#allocation5 + $0x1d4] sm:$0xf0]  ;;  %v2684_v54 = vld [vmem:[#allocation5 + $0x288] sm:$0xf] }
  0x6c   :  { %1465 = vmatpush.bf16.msrb.mxu2 %v3065_v15  ;;  %v3001_v15 = vor.u32 %v3622_v2, %v2998_v3  ;;  %v2589_v24 = vor.u32 %v3521_v17, %v2588_v16  ;;  %v2540_v58 = vld [vmem:[#allocation5 + $0x168] sm:$0xf]  ;;  %v3509_v59 = vld [vmem:[#allocation5 + $0x174] sm:$0xf0] }
  0x6d   :  { %1453 = vmatpush.bf16.msra.mxu3 %v2921_v21  ;;  %v3585_v21 = vld [vmem:[#allocation5 + $0x3d4] sm:$0xf0]  ;;  %v2796_v62 = vld [vmem:[#allocation5 + $0x368] sm:$0xf]  ;;  %v2541_v2 = vor.u32 %v3509_v59, %v2540_v58 }
  0x6e   :  { %1428 = vmatpush.bf16.msra.mxu0 %v2649_v28  ;;  %v2572_v28 = vld [vmem:[#allocation5 + $0x1a8] sm:$0xf]  ;;  %v2845_v31 = vor.u32 %v3585_v21, %v2844_v20  ;;  %v3573_v63 = vld [vmem:[#allocation5 + $0x374] sm:$0xf0] }
  0x6f   :  { %1441 = vmatpush.bf16.msra.mxu1 %v2777_v29  ;;  %v3517_v29 = vld [vmem:[#allocation5 + $0x1b4] sm:$0xf0]  ;;  %v2524_v7 = vld [vmem:[#allocation5 + $0x148] sm:$0xf]  ;;  %v2797_v9 = vor.u32 %v3573_v63, %v2796_v62 }
  0x70   :  { %1466 = vmatpush.bf16.msrb.mxu2 %v3049_v27  ;;  %v3553_v27 = vld [vmem:[#allocation5 + $0x2d4] sm:$0xf0]  ;;  %v2573_v38 = vor.u32 %v3517_v29, %v2572_v28  ;;  %v2780_v11 = vld [vmem:[#allocation5 + $0x348] sm:$0xf] }
  0x71   :  { %1454 = vmatpush.bf16.msra.mxu3 %v2905_v34  ;;  %v3581_v34 = vld [vmem:[#allocation5 + $0x3b4] sm:$0xf0]  ;;  %v2717_v37 = vor.u32 %v3553_v27, %v2716_v26  ;;  %v2380_v13 = vld [vmem:[#allocation5 + $0x28] sm:$0xf] }
  0x72   :  { %1429 = vmatpush.bf16.msra.mxu0 %v2633_v46  ;;  %v2829_v44 = vor.u32 %v3581_v34, %v2828_v33  ;;  %v2429_v46 = vor.u32 %v3481_v39, %v2428_v36  ;;  %v3473_v3 = vld [vmem:[#allocation5 + $0x54] sm:$0xf0]  ;;  %v2652_v17 = vld [vmem:[#allocation5 + $0x248] sm:$0xf] }
  0x73   :  { %1442 = vmatpush.bf16.msra.mxu1 %v2761_v47  ;;  %v2812_v47 = vld [vmem:[#allocation5 + $0x388] sm:$0xf]  ;;  %v3505_v8 = vld [vmem:[#allocation5 + $0x154] sm:$0xf0] }
  0x74   :  { %1467 = vmatpush.bf16.msrb.mxu2 %v3033_v41  ;;  %v3549_v41 = vld [vmem:[#allocation5 + $0x2b4] sm:$0xf0]  ;;  %v2764_v22 = vld [vmem:[#allocation5 + $0x328] sm:$0xf] }
  0x75   :  { %1455 = vmatpush.bf16.msra.mxu3 %v2889_v52  ;;  %v2701_v50 = vor.u32 %v3549_v41, %v2700_v40  ;;  %v2557_v52 = vor.u32 %v3513_v43, %v2556_v42  ;;  %v3469_v16 = vld [vmem:[#allocation5 + $0x34] sm:$0xf0]  ;;  %v2364_v25 = vld [vmem:[#allocation5 + $0x8] sm:$0xf] }
  0x76   :  { %1430 = vmatpush.bf16.msra.mxu0 %v2617_v0  ;;  %v2396_v0 = vld [vmem:[#allocation5 + $0x48] sm:$0xf]  ;;  %v3501_v20 = vld [vmem:[#allocation5 + $0x134] sm:$0xf0] }
  0x77   :  { %1443 = vmatpush.bf16.msra.mxu1 %v2745_v1  ;;  %v2685_v1 = vor.u32 %v3545_v56, %v2684_v54  ;;  %v3465_v26 = vld [vmem:[#allocation5 + $0x14] sm:$0xf0]  ;;  %v2492_v29 = vld [vmem:[#allocation5 + $0x108] sm:$0xf] }
  0x78   :  { %1468 = vmatpush.bf16.msrb.mxu2 %v3017_v60  ;;  %v2813_v60 = vor.u32 %v3577_v48, %v2812_v47  ;;  %v3497_v33 = vld [vmem:[#allocation5 + $0x114] sm:$0xf0]  ;;  %v2988_v34 = vld [vmem:[#allocation5 + $0x4e8] sm:$0xf]  ;;  %v2365_v41 = vor.u32 %v3465_v26, %v2364_v25  ;;  %v3479_v25 = vld [vmem:[#allocation5 + $0x8c] sm:$0xf] }
  0x79   :  { %1456 = vmatpush.bf16.msra.mxu3 %v2873_v5  ;;  %1431 = vmatmul.bf16.vlgmr.msra.gmra.mxu0 %v3970_v51  ;;  %v2668_v5 = vld [vmem:[#allocation5 + $0x268] sm:$0xf]  ;;  %v3621_v36 = vld [vmem:[#allocation5 + $0x4f4] sm:$0xf0]  ;;  %v2493_v47 = vor.u32 %v3497_v33, %v2492_v29  ;;  %v3515_v29 = vld [vmem:[#allocation5 + $0x1ac] sm:$0xf] }
  0x7a   :  { %1482 = vmatpush.bf16.msrb.mxu0 %v3129_v12  ;;  %1444 = vmatmul.bf16.vlgmr.msra.gmra.mxu1 %v3974_v57  ;;  %v3569_v12 = vld [vmem:[#allocation5 + $0x354] sm:$0xf0]  ;;  %v2748_v40 = vld [vmem:[#allocation5 + $0x308] sm:$0xf]  ;;  %v2989_v48 = vor.u32 %v3621_v36, %v2988_v34 }
  0x7b   :  { %1488 = vmatpush.bf16.msrb.mxu1 %v2477_v6  ;;  %v3541_v6 = vld [vmem:[#allocation5 + $0x274] sm:$0xf0]  ;;  %v2781_v21 = vor.u32 %v3569_v12, %v2780_v11  ;;  %v2972_v49 = vld [vmem:[#allocation5 + $0x4c8] sm:$0xf] }
  0x7c   :  { %1469 = vmatpush.bf16.msrb.mxu2 %v3001_v15  ;;  %1457 = vmatmul.bf16.vlgmr.msra.gmra.mxu3 %v3986_v30  ;;  %v2669_v14 = vor.u32 %v3541_v6, %v2668_v5  ;;  %v2525_v15 = vor.u32 %v3505_v8, %v2524_v7  ;;  %v3653_v39 = vld [vmem:[#allocation5 + $0x5f4] sm:$0xf0]  ;;  %v3132_v56 = vld [vmem:[#allocation5 + $0x608] sm:$0xf]  ;;  %v3523_v5 = vld [vmem:[#allocation5 + $0x1ec] sm:$0xf] }
  0x7d   :  { %1501 = vmatpush.bf16.msrb.mxu3 %v2605_v10  ;;  %v2397_v10 = vor.u32 %v3473_v3, %v2396_v0  ;;  %v3561_v42 = vld [vmem:[#allocation5 + $0x314] sm:$0xf0]  ;;  %v3487_v0 = vld [vmem:[#allocation5 + $0xcc] sm:$0xf]  ;;  %v2606_v6 = vld [vmem:[#allocation5 + $0x1f8] sm:$0xf0] }
  0x7e   :  { %1514 = vmatpush.bf16.msra.mxu0 %v2733_v23  ;;  %v2381_v23 = vor.u32 %v3469_v16, %v2380_v13  ;;  %v3617_v54 = vld [vmem:[#allocation5 + $0x4d4] sm:$0xf0]  ;;  %v2749_v59 = vor.u32 %v3561_v42, %v2748_v40  ;;  %v2956_v8 = vld [vmem:[#allocation5 + $0x4a8] sm:$0xf]  ;;  %v3483_v13 = vld [vmem:[#allocation5 + $0xac] sm:$0xf] }
  0x7f   :  { %1489 = vmatpush.bf16.msrb.mxu1 %v2461_v19  ;;  %1470 = vmatmul.bf16.vlgmr.msrb.gmra.mxu2 %v3988_v35  ;;  %v2508_v19 = vld [vmem:[#allocation5 + $0x128] sm:$0xf]  ;;  %v3657_v58 = vld [vmem:[#allocation5 + $0x614] sm:$0xf0]  ;;  %v2446_v16 = vld [vmem:[#allocation5 + $0xb8] sm:$0xf0] }
  0x80   :  { %1527 = vmatpush.bf16.msra.mxu2 %v2861_v18  ;;  %v3537_v18 = vld [vmem:[#allocation5 + $0x254] sm:$0xf0]  ;;  %v2509_v28 = vor.u32 %v3501_v20, %v2508_v19  ;;  %v3133_v3 = vor.u32 %v3657_v58, %v3132_v56  ;;  %v2940_v20 = vld [vmem:[#allocation5 + $0x488] sm:$0xf]  ;;  %v2414_v42 = vld [vmem:[#allocation5 + $0x78] sm:$0xf0] }
  0x81   :  { %1502 = vmatpush.bf16.msrb.mxu3 %v2589_v24  ;;  %v3565_v24 = vld [vmem:[#allocation5 + $0x334] sm:$0xf0]  ;;  %v2653_v27 = vor.u32 %v3537_v18, %v2652_v17  ;;  %v3519_v17 = vld [vmem:[#allocation5 + $0x1cc] sm:$0xf]  ;;  %v2590_v18 = vld [vmem:[#allocation5 + $0x1d8] sm:$0xf0] }
  0x82   :  { %1515 = vmatpush.bf16.msra.mxu0 %v2717_v37  ;;  %v2765_v37 = vor.u32 %v3565_v24, %v2764_v22  ;;  %v3645_v11 = vld [vmem:[#allocation5 + $0x5b4] sm:$0xf0]  ;;  %v3068_v22 = vld [vmem:[#allocation5 + $0x588] sm:$0xf]  ;;  %v2449_v24 = vor.u32 %v3483_v13, %v2446_v16  ;;  %v2593_v26 = vor.u32 %v3519_v17, %v2590_v18  ;;  %v2398_v58 = vld [vmem:[#allocation5 + $0x58] sm:$0xf0] }
  0x83   :  { %1490 = vmatpush.bf16.msrb.mxu1 %v2445_v32  ;;  %v3533_v32 = vld [vmem:[#allocation5 + $0x234] sm:$0xf0]  ;;  %v2924_v33 = vld [vmem:[#allocation5 + $0x468] sm:$0xf]  ;;  %v2734_v16 = vld [vmem:[#allocation5 + $0x2f8] sm:$0xf0] }
  0x84   :  { %1528 = vmatpush.bf16.msra.mxu2 %v2845_v31  ;;  %v2636_v31 = vld [vmem:[#allocation5 + $0x228] sm:$0xf]  ;;  %v3605_v34 = vld [vmem:[#allocation5 + $0x474] sm:$0xf0]  ;;  %v3587_v18 = vld [vmem:[#allocation5 + $0x3ec] sm:$0xf] }
  0x85   :  { %1503 = vmatpush.bf16.msrb.mxu3 %v2573_v38  ;;  %v3116_v38 = vld [vmem:[#allocation5 + $0x5e8] sm:$0xf]  ;;  %v2637_v43 = vor.u32 %v3533_v32, %v2636_v31  ;;  %v2574_v31 = vld [vmem:[#allocation5 + $0x1b8] sm:$0xf0] }
  0x86   :  { %1516 = vmatpush.bf16.msra.mxu0 %v2701_v50  ;;  %v2620_v50 = vld [vmem:[#allocation5 + $0x208] sm:$0xf]  ;;  %v3117_v53 = vor.u32 %v3653_v39, %v3116_v38  ;;  %v3475_v39 = vld [vmem:[#allocation5 + $0x6c] sm:$0xf]  ;;  %v2577_v40 = vor.u32 %v3515_v29, %v2574_v31  ;;  %v2718_v31 = vld [vmem:[#allocation5 + $0x2d8] sm:$0xf0] }
  0x87   :  { %1491 = vmatpush.bf16.msrb.mxu1 %v2429_v46  ;;  %v2478_v46 = vld [vmem:[#allocation5 + $0xf8] sm:$0xf0]  ;;  %v3052_v36 = vld [vmem:[#allocation5 + $0x568] sm:$0xf] }
  0x88   :  { %1529 = vmatpush.bf16.msra.mxu2 %v2829_v44  ;;  %v3491_v44 = vld [vmem:[#allocation5 + $0xec] sm:$0xf]  ;;  %v3004_v13 = vld [vmem:[#allocation5 + $0x508] sm:$0xf] }
  0x89   :  { %1504 = vmatpush.bf16.msrb.mxu3 %v2557_v52  ;;  %3139 = vmatmul.msk.bf16.vlgmr.msrb.gmra.mxu0 %vm1302_vm0, %v3982_v45  ;;  %v3529_v52 = vld [vmem:[#allocation5 + $0x214] sm:$0xf0]  ;;  %v2481_v62 = vor.u32 %v3491_v44, %v2478_v46  ;;  %v2558_v44 = vld [vmem:[#allocation5 + $0x198] sm:$0xf0] }
  0x8a   :  { %1517 = vmatpush.bf16.msra.mxu0 %v2685_v1  ;;  %v2621_v63 = vor.u32 %v3529_v52, %v2620_v50  ;;  %v2973_v1 = vor.u32 %v3617_v54, %v2972_v49  ;;  %v3036_v49 = vld [vmem:[#allocation5 + $0x548] sm:$0xf]  ;;  %v3633_v50 = vld [vmem:[#allocation5 + $0x554] sm:$0xf0]  ;;  %v2417_v52 = vor.u32 %v3475_v39, %v2414_v42  ;;  %v3615_v39 = vld [vmem:[#allocation5 + $0x4cc] sm:$0xf] }
  0x8b   :  { %1492 = vmatpush.bf16.msrb.mxu1 %v2413_v61  ;;  %v3649_v61 = vld [vmem:[#allocation5 + $0x5d4] sm:$0xf0]  ;;  %v2974_v42 = vld [vmem:[#allocation5 + $0x4d8] sm:$0xf0] }
  0x8c   :  { %1530 = vmatpush.bf16.msra.mxu2 %v2813_v60  ;;  %v3100_v60 = vld [vmem:[#allocation5 + $0x5c8] sm:$0xf] }
  0x8d   :  { %1505 = vmatpush.bf16.msrb.mxu3 %v2541_v2  ;;  %v2462_v2 = vld [vmem:[#allocation5 + $0xd8] sm:$0xf0]  ;;  %v3101_v7 = vor.u32 %v3649_v61, %v3100_v60  ;;  %v3037_v61 = vor.u32 %v3633_v50, %v3036_v49 }
  0x8e   :  { %1518 = vmatpush.bf16.msra.mxu0 %v2669_v14  ;;  %v2465_v12 = vor.u32 %v3487_v0, %v2462_v2  ;;  %v2609_v14 = vor.u32 %v3523_v5, %v2606_v6  ;;  %v2542_v60 = vld [vmem:[#allocation5 + $0x178] sm:$0xf0]  ;;  %v3020_v0 = vld [vmem:[#allocation5 + $0x528] sm:$0xf] }
  0x8f   :  { %1493 = vmatpush.bf16.msrb.mxu1 %v2397_v10  ;;  %v3084_v10 = vld [vmem:[#allocation5 + $0x5a8] sm:$0xf]  ;;  %v2494_v49 = vld [vmem:[#allocation5 + $0x118] sm:$0xf0] }
  0x90   :  { %1531 = vmatpush.bf16.msra.mxu2 %v2797_v9  ;;  %v3613_v9 = vld [vmem:[#allocation5 + $0x4b4] sm:$0xf0]  ;;  %v3085_v19 = vor.u32 %v3645_v11, %v3084_v10  ;;  %v2876_v11 = vld [vmem:[#allocation5 + $0x408] sm:$0xf]  ;;  %v2830_v50 = vld [vmem:[#allocation5 + $0x3b8] sm:$0xf0] }
  0x91   :  { %1506 = vmatpush.bf16.msrb.mxu3 %v2525_v15  ;;  %v2957_v15 = vor.u32 %v3613_v9, %v2956_v8  ;;  %v3503_v8 = vld [vmem:[#allocation5 + $0x14c] sm:$0xf]  ;;  %v2526_v9 = vld [vmem:[#allocation5 + $0x158] sm:$0xf0] }
  0x92   :  { %1519 = vmatpush.bf16.msra.mxu0 %v2653_v27 }
  0x93   :  { %1494 = vmatpush.bf16.msrb.mxu1 %v2381_v23  ;;  %v3641_v23 = vld [vmem:[#allocation5 + $0x594] sm:$0xf0] }
  0x94   :  { %1532 = vmatpush.bf16.msra.mxu2 %v2781_v21  ;;  %v3609_v21 = vld [vmem:[#allocation5 + $0x494] sm:$0xf0]  ;;  %v3069_v32 = vor.u32 %v3641_v23, %v3068_v22  ;;  %v3463_v22 = vld [vmem:[#allocation5 + $0xc] sm:$0xf]  ;;  %v2366_v23 = vld [vmem:[#allocation5 + $0x18] sm:$0xf0] }
  0x95   :  { %1507 = vmatpush.bf16.msrb.mxu3 %v2509_v28  ;;  %v2941_v27 = vor.u32 %v3609_v21, %v2940_v20  ;;  %v2430_v28 = vld [vmem:[#allocation5 + $0x98] sm:$0xf0]  ;;  %v2529_v20 = vor.u32 %v3503_v8, %v2526_v9  ;;  %v3607_v8 = vld [vmem:[#allocation5 + $0x48c] sm:$0xf] }
  0x96   :  { %1520 = vmatpush.bf16.msra.mxu0 %v2637_v43  ;;  %v2433_v38 = vor.u32 %v3479_v25, %v2430_v28  ;;  %v3511_v43 = vld [vmem:[#allocation5 + $0x18c] sm:$0xf]  ;;  %v2942_v9 = vld [vmem:[#allocation5 + $0x498] sm:$0xf0] }
  0x97   :  { %1495 = vmatpush.bf16.msrb.mxu1 %v2365_v41  ;;  %v2925_v41 = vor.u32 %v3605_v34, %v2924_v33  ;;  %v2561_v54 = vor.u32 %v3511_v43, %v2558_v44  ;;  %v3551_v28 = vld [vmem:[#allocation5 + $0x2cc] sm:$0xf]  ;;  %v2510_v33 = vld [vmem:[#allocation5 + $0x138] sm:$0xf0]  ;;  %v2369_v34 = vor.u32 %v3463_v22, %v2366_v23 }
  0x98   :  { %1533 = vmatpush.bf16.msra.mxu2 %v2765_v37  ;;  %v3637_v37 = vld [vmem:[#allocation5 + $0x574] sm:$0xf0]  ;;  %v3547_v43 = vld [vmem:[#allocation5 + $0x2ac] sm:$0xf]  ;;  %v2702_v44 = vld [vmem:[#allocation5 + $0x2b8] sm:$0xf0] }
  0x99   :  { %1508 = vmatpush.bf16.msrb.mxu3 %v2493_v47  ;;  %v3053_v46 = vor.u32 %v3637_v37, %v3052_v36  ;;  %v2908_v47 = vld [vmem:[#allocation5 + $0x448] sm:$0xf]  ;;  %v3583_v36 = vld [vmem:[#allocation5 + $0x3cc] sm:$0xf]  ;;  %v2846_v37 = vld [vmem:[#allocation5 + $0x3d8] sm:$0xf0] }
  0x9a   :  { %1496 = vmatmul.bf16.vlgmr.msrb.gmra.mxu1 %v3972_v55  ;;  %1521 = vmatpush.bf16.msra.mxu0 %v2621_v63  ;;  %v3597_v63 = vld [vmem:[#allocation5 + $0x434] sm:$0xf0] }
  0x9b   :  { %1540 = vmatpush.bf16.msra.mxu1 %v2989_v48  ;;  %v3601_v48 = vld [vmem:[#allocation5 + $0x454] sm:$0xf0] }
  0x9c   :  { %1534 = vmatpush.bf16.msra.mxu2 %v2749_v59  ;;  %1509 = vmatmul.bf16.vlgmr.msrb.gmra.mxu3 %v3978_v4  ;;  %v2909_v56 = vor.u32 %v3601_v48, %v2908_v47  ;;  %v3507_v59 = vld [vmem:[#allocation5 + $0x16c] sm:$0xf] }
  0x9d   :  { %1553 = vmatpush.bf16.msra.mxu3 %v3117_v53  ;;  %1522 = vmatmul.bf16.vlgmr.msra.gmra.mxu0 %v3970_v51  ;;  %v3471_v53 = vld [vmem:[#allocation5 + $0x4c] sm:$0xf]  ;;  %v2545_v5 = vor.u32 %v3507_v59, %v2542_v60  ;;  %v2958_v60 = vld [vmem:[#allocation5 + $0x4b8] sm:$0xf0] }
  0x9e   :  { %1573 = vmatpush.bf16.msrb.mxu0 %v3133_v3  ;;  %v2401_v2 = vor.u32 %v3471_v53, %v2398_v58  ;;  %v3467_v3 = vld [vmem:[#allocation5 + $0x2c] sm:$0xf]  ;;  %v3118_v53 = vld [vmem:[#allocation5 + $0x5f8] sm:$0xf0] }
  0x9f   :  { %1541 = vmatpush.bf16.msra.mxu1 %v2973_v1  ;;  %1535 = vmatmul.bf16.vlgmr.msra.gmra.mxu2 %v3974_v57  ;;  %v3629_v1 = vld [vmem:[#allocation5 + $0x534] sm:$0xf0]  ;;  %v3579_v47 = vld [vmem:[#allocation5 + $0x3ac] sm:$0xf] }
  0xa0   :  { %1579 = vmatpush.bf16.msrb.mxu2 %v2481_v62  ;;  %v2892_v62 = vld [vmem:[#allocation5 + $0x428] sm:$0xf]  ;;  %v3021_v10 = vor.u32 %v3629_v1, %v3020_v0  ;;  %v3495_v48 = vld [vmem:[#allocation5 + $0x10c] sm:$0xf]  ;;  %v2686_v0 = vld [vmem:[#allocation5 + $0x298] sm:$0xf0] }
  0xa1   :  { %1554 = vmatpush.bf16.msra.mxu3 %v3101_v7  ;;  %v2893_v6 = vor.u32 %v3597_v63, %v2892_v62  ;;  %v2382_v7 = vld [vmem:[#allocation5 + $0x38] sm:$0xf0]  ;;  %v2497_v58 = vor.u32 %v3495_v48, %v2494_v49  ;;  %v3611_v59 = vld [vmem:[#allocation5 + $0x4ac] sm:$0xf]  ;;  %v4018_v49 = vld [vmem:[#allocation7] sm:$0xf] }
  0xa2   :  { %1592 = vmatpush.bf16.msra.mxu0 %v2609_v14  ;;  %v3625_v14 = vld [vmem:[#allocation5 + $0x514] sm:$0xf0]  ;;  %v2385_v17 = vor.u32 %v3467_v3, %v2382_v7  ;;  %v3543_v63 = vld [vmem:[#allocation5 + $0x28c] sm:$0xf] }
  0xa3   :  { %1542 = vmatpush.bf16.msra.mxu1 %v2957_v15  ;;  %v3555_v15 = vld [vmem:[#allocation5 + $0x2ec] sm:$0xf]  ;;  %v2689_v7 = vor.u32 %v3543_v63, %v2686_v0  ;;  %v3038_v0 = vld [vmem:[#allocation5 + $0x558] sm:$0xf0] }
  0xa4   :  { %1580 = vmatpush.bf16.msrb.mxu2 %v2465_v12  ;;  %v3593_v12 = vld [vmem:[#allocation5 + $0x414] sm:$0xf0]  ;;  %v2737_v25 = vor.u32 %v3555_v15, %v2734_v16  ;;  %v3575_v1 = vld [vmem:[#allocation5 + $0x38c] sm:$0xf]  ;;  %v2798_v15 = vld [vmem:[#allocation5 + $0x378] sm:$0xf0] }
  0xa5   :  { %1555 = vmatpush.bf16.msra.mxu3 %v3085_v19  ;;  %v2862_v19 = vld [vmem:[#allocation5 + $0x3f8] sm:$0xf0]  ;;  %v2877_v21 = vor.u32 %v3593_v12, %v2876_v11  ;;  %v3647_v3 = vld [vmem:[#allocation5 + $0x5cc] sm:$0xf] }
  0xa6   :  { %1593 = vmatpush.bf16.msra.mxu0 %v2593_v26  ;;  %v3619_v26 = vld [vmem:[#allocation5 + $0x4ec] sm:$0xf]  ;;  %v2865_v29 = vor.u32 %v3587_v18, %v2862_v19  ;;  %v2945_v18 = vor.u32 %v3607_v8, %v2942_v9 }
  0xa7   :  { %1543 = vmatpush.bf16.msra.mxu1 %v2941_v27  ;;  %v2990_v27 = vld [vmem:[#allocation5 + $0x4f8] sm:$0xf0]  ;;  %v3539_v12 = vld [vmem:[#allocation5 + $0x26c] sm:$0xf] }
  0xa8   :  { %1581 = vmatpush.bf16.msrb.mxu2 %v2449_v24  ;;  %v3005_v24 = vor.u32 %v3625_v14, %v3004_v13  ;;  %v3571_v13 = vld [vmem:[#allocation5 + $0x36c] sm:$0xf] }
  0xa9   :  { %1556 = vmatpush.bf16.msra.mxu3 %v3069_v32  ;;  %v3499_v32 = vld [vmem:[#allocation5 + $0x12c] sm:$0xf]  ;;  %v2801_v22 = vor.u32 %v3571_v13, %v2798_v15  ;;  %v3134_v15 = vld [vmem:[#allocation5 + $0x618] sm:$0xf0] }
  0xaa   :  { %1594 = vmatpush.bf16.msra.mxu0 %v2577_v40  ;;  %v2721_v40 = vor.u32 %v3551_v28, %v2718_v31  ;;  %v3643_v16 = vld [vmem:[#allocation5 + $0x5ac] sm:$0xf]  ;;  %v2782_v28 = vld [vmem:[#allocation5 + $0x358] sm:$0xf0] }
  0xab   :  { %1544 = vmatpush.bf16.msra.mxu1 %v2925_v41  ;;  %v2513_v41 = vor.u32 %v3499_v32, %v2510_v33  ;;  %v3070_v31 = vld [vmem:[#allocation5 + $0x598] sm:$0xf0]  ;;  %v3631_v63 = vld [vmem:[#allocation5 + $0x54c] sm:$0xf] }
  0xac   :  { %1582 = vmatpush.bf16.msrb.mxu2 %v2433_v38  ;;  %v2993_v38 = vor.u32 %v3619_v26, %v2990_v27  ;;  %v3567_v26 = vld [vmem:[#allocation5 + $0x34c] sm:$0xf] }
  0xad   :  { %1557 = vmatpush.bf16.msra.mxu3 %v3053_v46  ;;  %3140 = vmatmul.msk.bf16.vlgmr.msrb.gmra.mxu0 %vm1302_vm0, %v3982_v45  ;;  %v2849_v46 = vor.u32 %v3583_v36, %v2846_v37  ;;  %v2910_v36 = vld [vmem:[#allocation5 + $0x458] sm:$0xf0]  ;;  %v3591_v9 = vld [vmem:[#allocation5 + $0x40c] sm:$0xf] }
  0xae   :  { %1595 = vmatpush.bf16.msra.mxu0 %v2561_v54  ;;  %v2977_v54 = vor.u32 %v3615_v39, %v2974_v42  ;;  %v3563_v42 = vld [vmem:[#allocation5 + $0x32c] sm:$0xf] }
  0xaf   :  { %1545 = vmatpush.bf16.msra.mxu1 %v2909_v56  ;;  %v2705_v56 = vor.u32 %v3547_v43, %v2702_v44  ;;  %v2766_v43 = vld [vmem:[#allocation5 + $0x338] sm:$0xf0]  ;;  %v3635_v44 = vld [vmem:[#allocation5 + $0x56c] sm:$0xf] }
  0xb0   :  { %1583 = vmatpush.bf16.msrb.mxu2 %v2417_v52  ;;  %v3651_v52 = vld [vmem:[#allocation5 + $0x5ec] sm:$0xf] }
  0xb1   :  { %1558 = vmatpush.bf16.msra.mxu3 %v3037_v61  ;;  %v2833_v61 = vor.u32 %v3579_v47, %v2830_v50  ;;  %v3121_v62 = vor.u32 %v3651_v52, %v3118_v53  ;;  %v3595_v52 = vld [vmem:[#allocation5 + $0x42c] sm:$0xf]  ;;  %v2894_v53 = vld [vmem:[#allocation5 + $0x438] sm:$0xf0] }
  0xb2   :  { %1596 = vmatpush.bf16.msra.mxu0 %v2545_v5  ;;  %v3102_v5 = vld [vmem:[#allocation5 + $0x5d8] sm:$0xf0]  ;;  %v3655_v13 = vld [vmem:[#allocation5 + $0x60c] sm:$0xf] }
  0xb3   :  { %1546 = vmatpush.bf16.msra.mxu1 %v2893_v6  ;;  %v2961_v6 = vor.u32 %v3611_v59, %v2958_v60  ;;  %v3105_v11 = vor.u32 %v3647_v3, %v3102_v5  ;;  %v2622_v59 = vld [vmem:[#allocation5 + $0x218] sm:$0xf0]  ;;  %v3559_v60 = vld [vmem:[#allocation5 + $0x30c] sm:$0xf]  ;;  %v3264_v5 = vld [vmem:[#allocation8 + $0xf0] sm:$0xf] }
  0xb4   :  { %1584 = vmatpush.bf16.msrb.mxu2 %v2401_v2  ;;  %v2814_v2 = vld [vmem:[#allocation5 + $0x398] sm:$0xf0] }
  0xb5   :  { %1559 = vmatpush.bf16.msra.mxu3 %v3021_v10  ;;  %v2817_v10 = vor.u32 %v3575_v1, %v2814_v2  ;;  %v2897_v2 = vor.u32 %v3595_v52, %v2894_v53  ;;  %v3673_v3 = vld [vmem:[#allocation8 + $0x74] sm:$0xf0]  ;;  %v3168_v53 = vld [vmem:[#allocation8 + $0x30] sm:$0xf] }
  0xb6   :  { %1597 = vmatpush.bf16.msra.mxu0 %v2529_v20  ;;  %v4009_v14 = vpop.f32.mrf.mxu0  ;;  %v3603_v20 = vld [vmem:[#allocation5 + $0x46c] sm:$0xf] }
  0xb7   :  { %1547 = vmatpush.bf16.msra.mxu1 %v2877_v21  ;;  %v2926_v21 = vld [vmem:[#allocation5 + $0x478] sm:$0xf0] }
  0xb8   :  { %1585 = vmatpush.bf16.msrb.mxu2 %v2385_v17  ;;  %v3086_v17 = vld [vmem:[#allocation5 + $0x5b8] sm:$0xf0]  ;;  %v2929_v32 = vor.u32 %v3603_v20, %v2926_v21 }
  0xb9   :  { %1560 = vmatpush.bf16.msra.mxu3 %v3005_v24  ;;  %v3089_v23 = vor.u32 %v3643_v16, %v3086_v17  ;;  %v3535_v24 = vld [vmem:[#allocation5 + $0x24c] sm:$0xf] }
  0xba   :  { %1548 = vmatmul.bf16.vlgmr.msra.gmra.mxu1 %v3986_v30  ;;  %1598 = vmatpush.bf16.msra.mxu0 %v2513_v41  ;;  %v2638_v41 = vld [vmem:[#allocation5 + $0x238] sm:$0xf0] }
  0xbb   :  { %1605 = vmatpush.bf16.msrb.mxu1 %v2737_v25  ;;  %v2654_v25 = vld [vmem:[#allocation5 + $0x258] sm:$0xf0] }
  0xbc   :  { %1586 = vmatpush.bf16.msrb.mxu2 %v2369_v34  ;;  %1561 = vmatmul.bf16.vlgmr.msra.gmra.mxu3 %v3988_v35  ;;  %v2657_v33 = vor.u32 %v3535_v24, %v2654_v25  ;;  %v3599_v34 = vld [vmem:[#allocation5 + $0x44c] sm:$0xf]  ;;  %v3137_v24 = vor.u32 %v3655_v13, %v3134_v15  ;;  %v3256_v25 = vld [vmem:[#allocation8 + $0xe0] sm:$0xf] }
  0xbd   :  { %1618 = vmatpush.bf16.msrb.mxu3 %v2865_v29  ;;  %v4012_v27 = vpop.f32.mrf.mxu1  ;;  %v3639_v29 = vld [vmem:[#allocation5 + $0x58c] sm:$0xf]  ;;  %v2913_v48 = vor.u32 %v3599_v34, %v2910_v36  ;;  %v3184_v34 = vld [vmem:[#allocation8 + $0x50] sm:$0xf]  ;;  %v3669_v36 = vld [vmem:[#allocation8 + $0x54] sm:$0xf0] }
  0xbe   :  { %1599 = vmatpush.bf16.msra.mxu0 %v2497_v58  ;;  %v3073_v39 = vor.u32 %v3639_v29, %v3070_v31  ;;  %v1317_v47 = vpop.f32.mrf.mxu0  ;;  %v3144_v15 = vld [vmem:[#allocation8] sm:$0xf] }
  0xbf   :  { %1606 = vmatpush.bf16.msrb.mxu1 %v2721_v40  ;;  %1587 = vmatmul.bf16.vlgmr.msrb.gmra.mxu2 %v3972_v55  ;;  %v2670_v55 = vld [vmem:[#allocation5 + $0x278] sm:$0xf0]  ;;  %v3531_v40 = vld [vmem:[#allocation5 + $0x22c] sm:$0xf]  ;;  %v3240_v47 = vld [vmem:[#allocation8 + $0xc0] sm:$0xf] }
  0xc0   :  { %1631 = vmatpush.bf16.msra.mxu2 %v2993_v38  ;;  %v2673_v19 = vor.u32 %v3539_v12, %v2670_v55  ;;  %v2785_v38 = vor.u32 %v3567_v26, %v2782_v28  ;;  %v2641_v50 = vor.u32 %v3531_v40, %v2638_v41  ;;  %v3041_v55 = vor.u32 %v3631_v63, %v3038_v0  ;;  %v3687_v26 = vld [vmem:[#allocation8 + $0xe4] sm:$0xf0]  ;;  %v3248_v40 = vld [vmem:[#allocation8 + $0xd0] sm:$0xf] }
  0xc1   :  { %1619 = vmatpush.bf16.msrb.mxu3 %v2849_v46  ;;  %1600 = vmatmul.bf16.vlgmr.msra.gmra.mxu0 %v3978_v4  ;;  %v4014_v4 = vpop.f32.mrf.mxu2  ;;  %v4016_v37 = vpop.f32.mrf.mxu3  ;;  %v3054_v46 = vld [vmem:[#allocation5 + $0x578] sm:$0xf0]  ;;  %v3663_v63 = vld [vmem:[#allocation8 + $0x24] sm:$0xf0] }
  0xc2   :  { %1644 = vmatpush.bf16.msrb.mxu0 %v3121_v62  ;;  %v3057_v58 = vor.u32 %v3635_v44, %v3054_v46  ;;  %v3200_v62 = vld [vmem:[#allocation8 + $0x70] sm:$0xf]  ;;  %v3176_v44 = vld [vmem:[#allocation8 + $0x40] sm:$0xf] }
  0xc3   :  { %1607 = vmatpush.bf16.msrb.mxu1 %v2705_v56  ;;  %v2769_v56 = vor.u32 %v3563_v42, %v2766_v43  ;;  %v3201_v17 = vor.u32 %v3673_v3, %v3200_v62  ;;  %v3185_v43 = vor.u32 %v3669_v36, %v3184_v34  ;;  %v3686_v34 = vld [vmem:[#allocation8 + $0xe4] sm:$0xf]  ;;  %v3258_v36 = vld [vmem:[#allocation8 + $0xe8] sm:$0xf0] }
  0xc4   :  { %1632 = vmatpush.bf16.msra.mxu2 %v2977_v54  ;;  %v3527_v54 = vld [vmem:[#allocation5 + $0x20c] sm:$0xf] }
  0xc5   :  { %1620 = vmatpush.bf16.msrb.mxu3 %v2833_v61  ;;  %v2750_v61 = vld [vmem:[#allocation5 + $0x318] sm:$0xf0]  ;;  %v1330_v1 = vpop.f32.mrf.mxu1  ;;  %v2625_v8 = vor.u32 %v3527_v54, %v2622_v59 }
  0xc6   :  { %1645 = vmatpush.bf16.msrb.mxu0 %v3105_v11  ;;  %v314_v11 = vperm.slane %v4018_v49, 0  ;;  %v2753_v12 = vor.u32 %v3559_v60, %v2750_v61  ;;  %v3681_v59 = vld [vmem:[#allocation8 + $0xb4] sm:$0xf0]  ;;  %v3224_v1 = vld [vmem:[#allocation8 + $0xa0] sm:$0xf] }
  0xc7   :  { %1608 = vmatpush.bf16.msrb.mxu1 %v2689_v7 }
  0xc8   :  { %1633 = vmatpush.bf16.msra.mxu2 %v2961_v6  ;;  %v3689_v6 = vld [vmem:[#allocation8 + $0xf4] sm:$0xf0]  ;;  %v1316_v28 = vadd.f32 %v4009_v14, %v314_v11 }
  0xc9   :  { %1621 = vmatpush.bf16.msrb.mxu3 %v2817_v10  ;;  %v1343_v7 = vpop.f32.mrf.mxu2  ;;  %v2878_v10 = vld [vmem:[#allocation5 + $0x418] sm:$0xf0]  ;;  %v1356_v16 = vpop.f32.mrf.mxu3  ;;  %v3265_v20 = vor.u32 %v3689_v6, %v3264_v5  ;;  %v3152_v6 = vld [vmem:[#allocation8 + $0x10] sm:$0xf] }
  0xca   :  { %1646 = vmatpush.bf16.msrb.mxu0 %v3089_v23  ;;  %v2881_v21 = vor.u32 %v3591_v9, %v2878_v10  ;;  %v3671_v23 = vld [vmem:[#allocation8 + $0x64] sm:$0xf0]  ;;  %v3685_v14 = vld [vmem:[#allocation8 + $0xd4] sm:$0xf0]  ;;  %v1329_v41 = vadd.f32 %v4012_v27, %v1316_v28 }
  0xcb   :  { %1609 = vmatpush.bf16.msrb.mxu1 %v2673_v19  ;;  %v3022_v19 = vld [vmem:[#allocation5 + $0x538] sm:$0xf0]  ;;  %v3249_v46 = vor.u32 %v3685_v14, %v3248_v40  ;;  %v3659_v16 = vld [vmem:[#allocation8 + $0x4] sm:$0xf0]  ;;  %v3668_v14 = vld [vmem:[#allocation8 + $0x54] sm:$0xf] }
  0xcc   :  { %1634 = vmatpush.bf16.msra.mxu2 %v2945_v18  ;;  %v3627_v18 = vld [vmem:[#allocation5 + $0x52c] sm:$0xf]  ;;  %v3665_v27 = vld [vmem:[#allocation8 + $0x34] sm:$0xf0] }
  0xcd   :  { %1622 = vmatpush.bf16.msrb.mxu3 %v2801_v22  ;;  %v3192_v22 = vld [vmem:[#allocation8 + $0x60] sm:$0xf]  ;;  %v3025_v29 = vor.u32 %v3627_v18, %v3022_v19  ;;  %v3169_v61 = vor.u32 %v3665_v27, %v3168_v53  ;;  %v3661_v7 = vld [vmem:[#allocation8 + $0x14] sm:$0xf0]  ;;  %v3202_v19 = vld [vmem:[#allocation8 + $0x78] sm:$0xf0] }
  0xce   :  { %1647 = vmatpush.bf16.msrb.mxu0 %v3073_v39  ;;  %v3193_v31 = vor.u32 %v3671_v23, %v3192_v22  ;;  %v3677_v11 = vld [vmem:[#allocation8 + $0x94] sm:$0xf0]  ;;  %v3688_v22 = vld [vmem:[#allocation8 + $0xf4] sm:$0xf]  ;;  %v3266_v23 = vld [vmem:[#allocation8 + $0xf8] sm:$0xf0] }
  0xcf   :  { %1610 = vmatpush.bf16.msrb.mxu1 %v2657_v33  ;;  %v3006_v33 = vld [vmem:[#allocation5 + $0x518] sm:$0xf0]  ;;  %v3666_v53 = vld [vmem:[#allocation8 + $0x44] sm:$0xf]  ;;  %v3178_v27 = vld [vmem:[#allocation8 + $0x48] sm:$0xf0] }
  0xd0   :  { %1635 = vmatpush.bf16.msra.mxu2 %v2929_v32  ;;  %v3623_v32 = vld [vmem:[#allocation5 + $0x50c] sm:$0xf] }
  0xd1   :  { %1623 = vmatpush.bf16.msrb.mxu3 %v2785_v38  ;;  %v3257_v38 = vor.u32 %v3687_v26, %v3256_v25  ;;  %v1393_v39 = vpop.f32.mrf.mxu2  ;;  %v3009_v42 = vor.u32 %v3623_v32, %v3006_v33  ;;  %v3269_v32 = vor.u32 %v3688_v22, %v3266_v23  ;;  %v3218_v22 = vld [vmem:[#allocation8 + $0x98] sm:$0xf0] }
  0xd2   :  { %1648 = vmatpush.bf16.msrb.mxu0 %v3057_v58  ;;  %v3232_v58 = vld [vmem:[#allocation8 + $0xb0] sm:$0xf] }
  0xd3   :  { %1611 = vmatpush.bf16.msrb.mxu1 %v2641_v50  ;;  %v3233_v0 = vor.u32 %v3681_v59, %v3232_v58  ;;  %v3242_v58 = vld [vmem:[#allocation8 + $0xc8] sm:$0xf0]  ;;  %v3312_v59 = vld [vmem:[#allocation8 + $0x150] sm:$0xf] }
  0xd4   :  { %1636 = vmatpush.bf16.msra.mxu2 %v2913_v48  ;;  %v3683_v48 = vld [vmem:[#allocation8 + $0xc4] sm:$0xf0] }
  0xd5   :  { %1624 = vmatpush.bf16.msrb.mxu3 %v2769_v56  ;;  %v3241_v54 = vor.u32 %v3683_v48, %v3240_v47 }
  0xd6   :  { %1649 = vmatpush.bf16.msrb.mxu0 %v3041_v55  ;;  %v1367_v52 = vpop.f32.mrf.mxu0  ;;  %v3153_v55 = vor.u32 %v3661_v7, %v3152_v6 }
  0xd7   :  { %1612 = vmatpush.bf16.msrb.mxu1 %v2625_v8  ;;  %v1380_v56 = vpop.f32.mrf.mxu1 }
  0xd8   :  { %1637 = vmatpush.bf16.msra.mxu2 %v2897_v2  ;;  %v3679_v2 = vld [vmem:[#allocation8 + $0xa4] sm:$0xf0] }
  0xd9   :  { %1625 = vmatpush.bf16.msrb.mxu3 %v2753_v12  ;;  %v3225_v9 = vor.u32 %v3679_v2, %v3224_v1 }
  0xda   :  { %1613 = vmatmul.bf16.vlgmr.msrb.gmra.mxu1 %v3970_v51  ;;  %1650 = vmatpush.bf16.msrb.mxu0 %v3025_v29  ;;  %v3667_v51 = vld [vmem:[#allocation8 + $0x44] sm:$0xf0] }
  0xdb   :  { %2081 = vmatpush.bf16.msra.mxu1 %v3265_v20  ;;  %v3177_v50 = vor.u32 %v3667_v51, %v3176_v44  ;;  %v3208_v20 = vld [vmem:[#allocation8 + $0x80] sm:$0xf]  ;;  %v3684_v44 = vld [vmem:[#allocation8 + $0xd4] sm:$0xf]  ;;  %v3250_v51 = vld [vmem:[#allocation8 + $0xd8] sm:$0xf0] }
  0xdc   :  { %1638 = vmatpush.bf16.msra.mxu2 %v2881_v21  ;;  %1626 = vmatmul.bf16.vlgmr.msrb.gmra.mxu3 %v3974_v57  ;;  %v1342_v57 = vadd.f32 %v4014_v4, %v1329_v41  ;;  %v3160_v4 = vld [vmem:[#allocation8 + $0x20] sm:$0xf]  ;;  %v3675_v21 = vld [vmem:[#allocation8 + $0x84] sm:$0xf0]  ;;  %v3186_v41 = vld [vmem:[#allocation8 + $0x58] sm:$0xf0] }
  0xdd   :  { %2068 = vmatpush.bf16.msra.mxu3 %v3201_v17  ;;  %v3161_v3 = vor.u32 %v3663_v63, %v3160_v4  ;;  %v3672_v17 = vld [vmem:[#allocation8 + $0x74] sm:$0xf]  ;;  %v3209_v29 = vor.u32 %v3675_v21, %v3208_v20  ;;  %v3170_v63 = vld [vmem:[#allocation8 + $0x38] sm:$0xf0]  ;;  %v3699_v20 = vld [vmem:[#allocation8 + $0x144] sm:$0xf0] }
  0xde   :  { %1651 = vmatpush.bf16.msrb.mxu0 %v3009_v42  ;;  %v1355_v60 = vadd.f32 %v4016_v37, %v1342_v57  ;;  %v3216_v37 = vld [vmem:[#allocation8 + $0x90] sm:$0xf]  ;;  %v3205_v26 = vor.u32 %v3672_v17, %v3202_v19  ;;  %v3261_v42 = vor.u32 %v3686_v34, %v3258_v36  ;;  %v3320_v57 = vld [vmem:[#allocation8 + $0x160] sm:$0xf]  ;;  %v3664_v4 = vld [vmem:[#allocation8 + $0x34] sm:$0xf] }
  0xdf   :  { %1639 = vmatmul.bf16.vlgmr.msra.gmra.mxu2 %v3986_v30  ;;  %2082 = vmatpush.bf16.msra.mxu1 %v3257_v38  ;;  %v1395_v30 = vpop.f32.mrf.mxu2  ;;  %v1406_v8 = vpop.f32.mrf.mxu3  ;;  %v3217_v18 = vor.u32 %v3677_v11, %v3216_v37  ;;  %v315_v38 = vperm.slane %v4018_v49, 1  ;;  %v3173_v7 = vor.u32 %v3664_v4, %v3170_v63  ;;  %v3678_v37 = vld [vmem:[#allocation8 + $0xa4] sm:$0xf]  ;;  %v3226_v11 = vld [vmem:[#allocation8 + $0xa8] sm:$0xf0] }
  0xe0   :  { %1664 = vmatpush.bf16.msrb.mxu2 %v3137_v24  ;;  %v1368_v62 = vadd.f32 %v1367_v52, %v1355_v60  ;;  %v1382_v10 = vpop.f32.mrf.mxu1  ;;  %v3145_v24 = vor.u32 %v3659_v16, %v3144_v15  ;;  %v3189_v52 = vor.u32 %v3668_v14, %v3186_v41  ;;  %v3701_v60 = vld [vmem:[#allocation8 + $0x154] sm:$0xf0]  ;;  %v3154_v15 = vld [vmem:[#allocation8 + $0x18] sm:$0xf0]  ;;  %v3229_v17 = vor.u32 %v3678_v37, %v3226_v11  ;;  %v3304_v19 = vld [vmem:[#allocation8 + $0x140] sm:$0xf] }
  0xe1   :  { %2069 = vmatpush.bf16.msra.mxu3 %v3193_v31  ;;  %1652 = vmatmul.bf16.vlgmr.msrb.gmra.mxu0 %v3988_v35  ;;  %v1369_v35 = vpop.f32.mrf.mxu0  ;;  %v3194_v31 = vld [vmem:[#allocation8 + $0x68] sm:$0xf0]  ;;  %v1407_v47 = vadd.f32 %v1406_v8, %v315_v38  ;;  %v3313_v1 = vor.u32 %v3701_v60, %v3312_v59  ;;  %v3305_v23 = vor.u32 %v3699_v20, %v3304_v19  ;;  %v3288_v34 = vld [vmem:[#allocation8 + $0x120] sm:$0xf]  ;;  %v3695_v36 = vld [vmem:[#allocation8 + $0x124] sm:$0xf0] }
  0xe2   :  { %v1381_v5 = vadd.f32 %v1380_v56, %v1368_v62  ;;  %v3682_v56 = vld [vmem:[#allocation8 + $0xc4] sm:$0xf]  ;;  %v3181_v62 = vor.u32 %v3666_v53, %v3178_v27  ;;  %v3162_v8 = vld [vmem:[#allocation8 + $0x28] sm:$0xf0]  ;;  %v3272_v27 = vld [vmem:[#allocation8 + $0x100] sm:$0xf] }
  0xe3   :  { %2083 = vmatpush.bf16.msra.mxu1 %v3249_v46  ;;  %v3705_v46 = vld [vmem:[#allocation8 + $0x174] sm:$0xf0]  ;;  %v3662_v35 = vld [vmem:[#allocation8 + $0x24] sm:$0xf]  ;;  %v3210_v14 = vld [vmem:[#allocation8 + $0x88] sm:$0xf0] }
  0xe4   :  { %v1394_v13 = vadd.f32 %v1393_v39, %v1381_v5  ;;  %v3234_v5 = vld [vmem:[#allocation8 + $0xb8] sm:$0xf0]  ;;  %v3704_v59 = vld [vmem:[#allocation8 + $0x174] sm:$0xf]  ;;  %v3322_v4 = vld [vmem:[#allocation8 + $0x168] sm:$0xf0] }
  0xe5   :  { %2070 = vmatpush.bf16.msra.mxu3 %v3185_v43  ;;  %v3328_v43 = vld [vmem:[#allocation8 + $0x170] sm:$0xf]  ;;  %v3330_v60 = vld [vmem:[#allocation8 + $0x178] sm:$0xf0]  ;;  %v3719_v20 = vld [vmem:[#allocation8 + $0x1e4] sm:$0xf0] }
  0xe6   :  { %v1670_v25 = vmax.f32 %v1394_v13, 0.0  ;;  %v3329_v48 = vor.u32 %v3705_v46, %v3328_v43  ;;  %v3660_v13 = vld [vmem:[#allocation8 + $0x14] sm:$0xf]  ;;  %v3289_v43 = vor.u32 %v3695_v36, %v3288_v34  ;;  %v3280_v46 = vld [vmem:[#allocation8 + $0x110] sm:$0xf] }
  0xe7   :  { %2084 = vmatpush.bf16.msra.mxu1 %v3241_v54  ;;  %v1419_v12 = vpop.f32.mrf.mxu2  ;;  %v1408_v28 = vpop.f32.mrf.mxu3  ;;  %v3253_v54 = vor.u32 %v3684_v44, %v3250_v51  ;;  %v3298_v37 = vld [vmem:[#allocation8 + $0x138] sm:$0xf0] }
  0xe8   :  { %v4032_v39 = vpack.c.bf16 %v1670_v25, %v1670_v25  ;;  %2094 = vmatpush.bf16.msra.mxu2 %v3329_v48  ;;  %v3697_v25 = vld [vmem:[#allocation8 + $0x134] sm:$0xf0] }
  0xe9   :  { %2071 = vmatpush.bf16.msra.mxu3 %v3177_v50  ;;  %v3703_v50 = vld [vmem:[#allocation8 + $0x164] sm:$0xf0] }
  0xea   :  { %v3321_v30 = vor.u32 %v3703_v50, %v3320_v57 }
  0xeb   :  { %2085 = vmatpush.bf16.msra.mxu1 %v3233_v0  ;;  %v3245_v0 = vor.u32 %v3682_v56, %v3242_v58 }
  0xec   :  { %2095 = vmatpush.bf16.msra.mxu2 %v3321_v30 }
  0xed   :  { %2072 = vmatpush.bf16.msra.mxu3 %v3169_v61  ;;  %v1420_v61 = vadd.f32 %v1419_v12, %v1407_v47  ;;  %v3693_v47 = vld [vmem:[#allocation8 + $0x114] sm:$0xf0] }
  0xef   :  { %3141 = vmatmul.msk.bf16.vlgmr.msrb.gmra.mxu2 %vm1302_vm0, %v3982_v45  ;;  %2086 = vmatpush.bf16.msra.mxu1 %v3225_v9  ;;  %v3670_v45 = vld [vmem:[#allocation8 + $0x64] sm:$0xf]  ;;  %v1421_v33 = vpop.f32.mrf.mxu2 }
  0xf0   :  { %v3197_v40 = vor.u32 %v3670_v45, %v3194_v31  ;;  %2096 = vmatpush.bf16.msra.mxu2 %v3313_v1  ;;  %v3658_v45 = vld [vmem:[#allocation8 + $0x4] sm:$0xf]  ;;  %v3700_v1 = vld [vmem:[#allocation8 + $0x154] sm:$0xf] }
  0xf1   :  { %2073 = vmatpush.bf16.msra.mxu3 %v3161_v3  ;;  %v3680_v3 = vld [vmem:[#allocation8 + $0xb4] sm:$0xf] }
  0xf2   :  { %v3237_v9 = vor.u32 %v3680_v3, %v3234_v5 }
  0xf3   :  { %2087 = vmatpush.bf16.msra.mxu1 %v3217_v18  ;;  %v3676_v18 = vld [vmem:[#allocation8 + $0x94] sm:$0xf] }
  0xf4   :  { %2097 = vmatpush.bf16.msra.mxu2 %v3305_v23  ;;  %v3221_v33 = vor.u32 %v3676_v18, %v3218_v22  ;;  %v3384_v18 = vld [vmem:[#allocation8 + $0x1e0] sm:$0xf]  ;;  %v3692_v22 = vld [vmem:[#allocation8 + $0x114] sm:$0xf]  ;;  %v3282_v23 = vld [vmem:[#allocation8 + $0x118] sm:$0xf0] }
  0xf5   :  { %2074 = vmatpush.bf16.msra.mxu3 %v3153_v55  ;;  %v3165_v55 = vor.u32 %v3662_v35, %v3162_v8 }
  0xf6   :  { %v1432_v2 = vpop.f32.mrf.mxu0 }
  0xf7   :  { %2088 = vmatpush.bf16.msra.mxu1 %v3209_v29  ;;  %v1433_v6 = vadd.f32 %v1432_v2, %v1420_v61  ;;  %v1445_v10 = vpop.f32.mrf.mxu1  ;;  %v3157_v29 = vor.u32 %v3660_v13, %v3154_v15  ;;  %v3333_v61 = vor.u32 %v3704_v59, %v3330_v60  ;;  %v3314_v2 = vld [vmem:[#allocation8 + $0x158] sm:$0xf0]  ;;  %v3721_v13 = vld [vmem:[#allocation8 + $0x1f4] sm:$0xf0] }
  0xf8   :  { %v3317_v5 = vor.u32 %v3700_v1, %v3314_v2 }
  0xf9   :  { %2075 = vmatpush.bf16.msra.mxu3 %v3145_v24  ;;  %v1446_v12 = vadd.f32 %v1445_v10, %v1433_v6  ;;  %v3296_v24 = vld [vmem:[#allocation8 + $0x130] sm:$0xf]  ;;  %v3306_v6 = vld [vmem:[#allocation8 + $0x148] sm:$0xf0]  ;;  %v3696_v10 = vld [vmem:[#allocation8 + $0x134] sm:$0xf] }
  0xfa   :  { %v3297_v31 = vor.u32 %v3697_v25, %v3296_v24  ;;  %v3376_v24 = vld [vmem:[#allocation8 + $0x1d0] sm:$0xf]  ;;  %v3717_v25 = vld [vmem:[#allocation8 + $0x1d4] sm:$0xf0] }
  0xfb   :  { %2133 = vmatpush.bf16.msrb.mxu1 %v3269_v32  ;;  %v3146_v32 = vld [vmem:[#allocation8 + $0x8] sm:$0xf0] }
  0xfc   :  { %2076 = vmatmul.bf16.vlgmr.msra.gmra.mxu3 %v4032_v39  ;;  %2098 = vmatpush.bf16.msra.mxu2 %v3297_v31  ;;  %v3377_v31 = vor.u32 %v3717_v25, %v3376_v24  ;;  %v3708_v25 = vld [vmem:[#allocation8 + $0x194] sm:$0xf] }
  0xfd   :  { %2120 = vmatpush.bf16.msrb.mxu3 %v3205_v26 }
  0xfe   :  { %v1434_v21 = vpop.f32.mrf.mxu0 }
  0xff   :  { %2134 = vmatpush.bf16.msrb.mxu1 %v3261_v42  ;;  %v1458_v16 = vpop.f32.mrf.mxu3  ;;  %v1447_v38 = vpop.f32.mrf.mxu1  ;;  %v3149_v42 = vor.u32 %v3658_v45, %v3146_v32  ;;  %v3385_v21 = vor.u32 %v3719_v20, %v3384_v18  ;;  %v3285_v45 = vor.u32 %v3692_v22, %v3282_v23  ;;  %v3690_v32 = vld [vmem:[#allocation8 + $0x104] sm:$0xf]  ;;  %v3362_v18 = vld [vmem:[#allocation8 + $0x1b8] sm:$0xf0]  ;;  %v3354_v22 = vld [vmem:[#allocation8 + $0x1a8] sm:$0xf0] }
 0x100   :  { %v1459_v26 = vadd.f32 %v1458_v16, %v1446_v12  ;;  %2099 = vmatpush.bf16.msra.mxu2 %v3289_v43  ;;  %v3301_v12 = vor.u32 %v3696_v10, %v3298_v37  ;;  %v3694_v16 = vld [vmem:[#allocation8 + $0x124] sm:$0xf]  ;;  %v317_v23 = vperm.slane %v4018_v49, 3 }
 0x101   :  { %2121 = vmatpush.bf16.msrb.mxu3 %v3197_v40  ;;  %v3674_v40 = vld [vmem:[#allocation8 + $0x84] sm:$0xf] }
 0x102   :  { %v1471_v28 = vpop.f32.mrf.mxu2  ;;  %v3213_v44 = vor.u32 %v3674_v40, %v3210_v14  ;;  %v3368_v40 = vld [vmem:[#allocation8 + $0x1c0] sm:$0xf]  ;;  %v3715_v14 = vld [vmem:[#allocation8 + $0x1c4] sm:$0xf0] }
 0x103   :  { %2135 = vmatpush.bf16.msrb.mxu1 %v3253_v54  ;;  %v1472_v41 = vadd.f32 %v1471_v28, %v1459_v26  ;;  %v3691_v54 = vld [vmem:[#allocation8 + $0x104] sm:$0xf0]  ;;  %v316_v26 = vperm.slane %v4018_v49, 2 }
 0x104   :  { %v3273_v30 = vor.u32 %v3691_v54, %v3272_v27 }
 0x105   :  { %2122 = vmatpush.bf16.msrb.mxu3 %v3189_v52  ;;  %v3281_v52 = vor.u32 %v3693_v47, %v3280_v46 }
 0x106   :  { %v1484_v48 = vpop.f32.mrf.mxu0 }
 0x107   :  { %2136 = vmatpush.bf16.msrb.mxu1 %v3245_v0  ;;  %v1460_v51 = vpop.f32.mrf.mxu3  ;;  %v1485_v57 = vadd.f32 %v1484_v48, %v1472_v41  ;;  %2100 = vmatpush.bf16.msra.mxu2 %v3281_v52 }
 0x108   :  { %v3713_v51 = vld [vmem:[#allocation8 + $0x1b4] sm:$0xf0] }
 0x109   :  { %2123 = vmatpush.bf16.msrb.mxu3 %v3181_v62  ;;  %v1671_v53 = vmax.f32 %v1485_v57, 0.0  ;;  %v3702_v62 = vld [vmem:[#allocation8 + $0x164] sm:$0xf]  ;;  %v3352_v57 = vld [vmem:[#allocation8 + $0x1a0] sm:$0xf] }
 0x10a   :  { %v1473_v50 = vpop.f32.mrf.mxu2  ;;  %v3325_v63 = vor.u32 %v3702_v62, %v3322_v4  ;;  %v3336_v4 = vld [vmem:[#allocation8 + $0x180] sm:$0xf] }
 0x10b   :  { %2137 = vmatpush.bf16.msrb.mxu1 %v3237_v9  ;;  %v1675_v56 = vpack.c.bf16 %v1671_v53, %v1671_v53  ;;  %2101 = vmatpush.bf16.msra.mxu2 %v3273_v30  ;;  %v3711_v50 = vld [vmem:[#allocation8 + $0x1a4] sm:$0xf0]  ;;  %v3709_v30 = vld [vmem:[#allocation8 + $0x194] sm:$0xf0] }
 0x10c   :  { %v3353_v53 = vor.u32 %v3711_v50, %v3352_v57 }
 0x10d   :  { %2124 = vmatpush.bf16.msrb.mxu3 %v3173_v7  ;;  %2089 = vmatmul.bf16.vlgmr.msra.gmra.mxu1 %v1675_v56 }
 0x10e   :  { %v1486_v58 = vpop.f32.mrf.mxu0 }
 0x10f   :  { %2138 = vmatpush.bf16.msrb.mxu1 %v3229_v17  ;;  %2146 = vmatpush.bf16.msrb.mxu2 %v3333_v61  ;;  %v3290_v17 = vld [vmem:[#allocation8 + $0x128] sm:$0xf0] }
 0x110   :  { %v3293_v19 = vor.u32 %v3694_v16, %v3290_v17  ;;  %v3712_v17 = vld [vmem:[#allocation8 + $0x1b4] sm:$0xf] }
 0x111   :  { %2125 = vmatpush.bf16.msrb.mxu3 %v3165_v55  ;;  %v3392_v55 = vld [vmem:[#allocation8 + $0x1f0] sm:$0xf]  ;;  %v3365_v20 = vor.u32 %v3712_v17, %v3362_v18  ;;  %v3731_v17 = vld [vmem:[#allocation10 + $0x48] sm:$0xff] }
 0x112   :  { %v3393_v15 = vor.u32 %v3721_v13, %v3392_v55  ;;  %v3714_v13 = vld [vmem:[#allocation8 + $0x1c4] sm:$0xf] }
 0x113   :  { %2139 = vmatpush.bf16.msrb.mxu1 %v3221_v33  ;;  %2147 = vmatpush.bf16.msrb.mxu2 %v3325_v63  ;;  %v3274_v33 = vld [vmem:[#allocation8 + $0x108] sm:$0xf0]  ;;  %v3707_v63 = vld [vmem:[#allocation8 + $0x184] sm:$0xf0] }
 0x114   :  { %2107 = vmatpush.bf16.msra.mxu0 %v3393_v15  ;;  %v3277_v38 = vor.u32 %v3690_v32, %v3274_v33  ;;  %v3337_v1 = vor.u32 %v3707_v63, %v3336_v4  ;;  %v3370_v15 = vld [vmem:[#allocation8 + $0x1c8] sm:$0xf0] }
 0x115   :  { %2126 = vmatpush.bf16.msrb.mxu3 %v3157_v29  ;;  %v3373_v16 = vor.u32 %v3714_v13, %v3370_v15  ;;  %v3733_v13 = vld [vmem:[#allocation10 + $0x58] sm:$0xff] }
 0x117   :  { %2140 = vmatpush.bf16.msrb.mxu1 %v3213_v44  ;;  %v1497_v0 = vpop.f32.mrf.mxu1  ;;  %2148 = vmatpush.bf16.msrb.mxu2 %v3317_v5  ;;  %v3360_v44 = vld [vmem:[#allocation8 + $0x1b0] sm:$0xf]  ;;  %v3394_v5 = vld [vmem:[#allocation8 + $0x1f8] sm:$0xf0] }
 0x118   :  { %2108 = vmatpush.bf16.msra.mxu0 %v3385_v21  ;;  %v1498_v36 = vadd.f32 %v1497_v0, %v316_v26  ;;  %v3361_v48 = vor.u32 %v3713_v51, %v3360_v44  ;;  %v3710_v21 = vld [vmem:[#allocation8 + $0x1a4] sm:$0xf]  ;;  %v3346_v26 = vld [vmem:[#allocation8 + $0x198] sm:$0xf0] }
 0x119   :  { %2127 = vmatpush.bf16.msrb.mxu3 %v3149_v42  ;;  %v3369_v42 = vor.u32 %v3715_v14, %v3368_v40  ;;  %v3357_v24 = vor.u32 %v3710_v21, %v3354_v22 }
 0x11a   :  { %v1523_v3 = vpop.f32.mrf.mxu0 }
 0x11c   :  { %2128 = vmatmul.bf16.vlgmr.msrb.gmra.mxu3 %v4032_v39  ;;  %v3698_v39 = vld [vmem:[#allocation8 + $0x144] sm:$0xf]  ;;  %2109 = vmatpush.bf16.msra.mxu0 %v3377_v31 }
 0x11d   :  { %v3309_v35 = vor.u32 %v3698_v39, %v3306_v6  ;;  %2141 = vmatmul.bf16.vlgmr.msrb.gmra.mxu1 %v1675_v56  ;;  %v3344_v56 = vld [vmem:[#allocation8 + $0x190] sm:$0xf] }
 0x11e   :  { %v3345_v60 = vor.u32 %v3709_v30, %v3344_v56 }
 0x11f   :  { %v1499_v7 = vpop.f32.mrf.mxu1  ;;  %v1510_v9 = vpop.f32.mrf.mxu3  ;;  %2149 = vmatpush.bf16.msrb.mxu2 %v3309_v35  ;;  %v3386_v35 = vld [vmem:[#allocation8 + $0x1e8] sm:$0xf0] }
 0x120   :  { %v1511_v41 = vadd.f32 %v1510_v9, %v1498_v36  ;;  %2110 = vmatpush.bf16.msra.mxu0 %v3369_v42  ;;  %v3718_v7 = vld [vmem:[#allocation8 + $0x1e4] sm:$0xf]  ;;  %v3338_v36 = vld [vmem:[#allocation8 + $0x188] sm:$0xf0] }
 0x121   :  { %v3389_v9 = vor.u32 %v3718_v7, %v3386_v35  ;;  %v3736_v7 = vld [vmem:[#allocation10 + $0x70] sm:$0xff]  ;;  %v3725_v35 = vld [vmem:[#allocation10 + $0x18] sm:$0xff] }
 0x122   :  { %v1536_v8 = vpop.f32.mrf.mxu2  ;;  %v1525_v11 = vpop.f32.mrf.mxu0  ;;  %v1524_v46 = vadd.f32 %v1523_v3, %v1511_v41  ;;  %v3720_v3 = vld [vmem:[#allocation8 + $0x1f4] sm:$0xf] }
 0x123   :  { %2150 = vmatpush.bf16.msrb.mxu2 %v3301_v12  ;;  %v3397_v39 = vor.u32 %v3720_v3, %v3394_v5  ;;  %v3716_v11 = vld [vmem:[#allocation8 + $0x1d4] sm:$0xf]  ;;  %v3378_v12 = vld [vmem:[#allocation8 + $0x1d8] sm:$0xf0]  ;;  %v3727_v5 = vld [vmem:[#allocation10 + $0x28] sm:$0xff] }
 0x124   :  { %2111 = vmatpush.bf16.msra.mxu0 %v3361_v48  ;;  %v1537_v52 = vadd.f32 %v1536_v8, %v1524_v46  ;;  %v3381_v55 = vor.u32 %v3716_v11, %v3378_v12  ;;  %v3728_v3 = vld [vmem:[#allocation10 + $0x30] sm:$0xff]  ;;  %v3722_v12 = vld [vmem:[#allocation10] sm:$0xff] }
 0x127   :  { %v1512_v29 = vpop.f32.mrf.mxu3  ;;  %2151 = vmatpush.bf16.msrb.mxu2 %v3293_v19 }
 0x128   :  { %2112 = vmatpush.bf16.msra.mxu0 %v3353_v53 }
 0x12a   :  { %v1538_v28 = vpop.f32.mrf.mxu2  ;;  %v1575_v34 = vpop.f32.mrf.mxu0 }
 0x12b   :  { %2152 = vmatpush.bf16.msrb.mxu2 %v3285_v45  ;;  %v3349_v28 = vor.u32 %v3708_v25, %v3346_v26 }
 0x12c   :  { %2113 = vmatpush.bf16.msra.mxu0 %v3345_v60 }
 0x12f   :  { %2153 = vmatpush.bf16.msrb.mxu2 %v3277_v38 }
 0x130   :  { %2114 = vmatpush.bf16.msra.mxu0 %v3337_v1 }
 0x132   :  { %v1577_v43 = vpop.f32.mrf.mxu0 }
 0x134   :  { %2159 = vmatpush.bf16.msrb.mxu0 %v3397_v39  ;;  %v3726_v39 = vld [vmem:[#allocation10 + $0x20] sm:$0xff] }
 0x137   :  { %v1549_v47 = vpop.f32.mrf.mxu1 }
 0x138   :  { %v1550_v27 = vadd.f32 %v1549_v47, %v1537_v52  ;;  %2160 = vmatpush.bf16.msrb.mxu0 %v3389_v9  ;;  %v3724_v9 = vld [vmem:[#allocation10 + $0x10] sm:$0xff] }
 0x13c   :  { %2161 = vmatpush.bf16.msrb.mxu0 %v3381_v55  ;;  %v3734_v55 = vld [vmem:[#allocation10 + $0x60] sm:$0xff] }
 0x13e   :  { %v1601_v62 = vpop.f32.mrf.mxu0 }
 0x13f   :  { %v1562_v54 = vpop.f32.mrf.mxu3  ;;  %v1551_v59 = vpop.f32.mrf.mxu1 }
 0x140   :  { %v1563_v58 = vadd.f32 %v1562_v54, %v1550_v27  ;;  %2162 = vmatpush.bf16.msrb.mxu0 %v3373_v16  ;;  %v1742_v27 = vld [vmem:[%s4051_s4] sm:$0x3]  ;;  %v3732_v16 = vld [vmem:[#allocation10 + $0x50] sm:$0xff] }
 0x141   :  { %v1744_v54 = vperm.slane %v1742_v27, 0 }
 0x142   :  { %v1588_v61 = vpop.f32.mrf.mxu2  ;;  %v1576_v0 = vadd.f32 %v1575_v34, %v1563_v58  ;;  %v3706_v34 = vld [vmem:[#allocation8 + $0x184] sm:$0xf] }
 0x143   :  { %v1589_v45 = vadd.f32 %v1588_v61, %v317_v23  ;;  %v3341_v40 = vor.u32 %v3706_v34, %v3338_v36  ;;  %v1745_v61 = vperm.slane %v1742_v27, 1  ;;  %v3750_v34 = vld [vmem:[%s4053_s6] ss:$0 sm:$0xff] }
 0x144   :  { %v1672_v2 = vmax.f32 %v1576_v0, 0.0  ;;  %2163 = vmatpush.bf16.msrb.mxu0 %v3365_v20 }
 0x145   :  { %v1602_v38 = vadd.f32 %v1601_v62, %v1589_v45 }
 0x146   :  { %v1676_v6 = vpack.c.bf16 %v1672_v2, %v1672_v2  ;;  %v1603_v37 = vpop.f32.mrf.mxu0  ;;  %v3729_v2 = vld [vmem:[#allocation10 + $0x38] sm:$0xff] }
 0x147   :  { %v1564_v8 = vpop.f32.mrf.mxu3  ;;  %2308 = vmatpush.bf16.msra.mxu3 %v3729_v2  ;;  %v3735_v37 = vld [vmem:[#allocation10 + $0x68] sm:$0xff] }
 0x148   :  { %2102 = vmatmul.bf16.vlgmr.msra.gmra.mxu2 %v1676_v6  ;;  %2164 = vmatpush.bf16.msrb.mxu0 %v3357_v24 }
 0x14a   :  { %v1590_v10 = vpop.f32.mrf.mxu2 }
 0x14b   :  { %2309 = vmatpush.bf16.msra.mxu3 %v3728_v3  ;;  %v3723_v10 = vld [vmem:[#allocation10 + $0x8] sm:$0xff] }
 0x14c   :  { %2165 = vmatpush.bf16.msrb.mxu0 %v3349_v28 }
 0x14f   :  { %2310 = vmatpush.bf16.msra.mxu3 %v3727_v5 }
 0x150   :  { %2166 = vmatpush.bf16.msrb.mxu0 %v3341_v40 }
 0x153   :  { %2311 = vmatpush.bf16.msra.mxu3 %v3726_v39 }
 0x157   :  { %v1614_v19 = vpop.f32.mrf.mxu1  ;;  %2312 = vmatpush.bf16.msra.mxu3 %v3725_v35 }
 0x158   :  { %2154 = vmatmul.bf16.vlgmr.msrb.gmra.mxu2 %v1676_v6  ;;  %v1615_v14 = vadd.f32 %v1614_v19, %v1602_v38  ;;  %v3737_v6 = vld [vmem:[#allocation10 + $0x78] sm:$0xff]  ;;  %v3730_v19 = vld [vmem:[#allocation10 + $0x40] sm:$0xff] }
 0x159   :  { %2321 = vmatpush.bf16.msra.mxu1 %v3737_v6 }
 0x15b   :  { %2313 = vmatpush.bf16.msra.mxu3 %v3724_v9 }
 0x15d   :  { %2322 = vmatpush.bf16.msra.mxu1 %v3736_v7 }
 0x15e   :  { %v1653_v33 = vpop.f32.mrf.mxu0 }
 0x15f   :  { %v1627_v29 = vpop.f32.mrf.mxu3  ;;  %v1616_v31 = vpop.f32.mrf.mxu1  ;;  %2314 = vmatpush.bf16.msra.mxu3 %v3723_v10 }
 0x160   :  { %v1628_v42 = vadd.f32 %v1627_v29, %v1615_v14 }
 0x161   :  { %2323 = vmatpush.bf16.msra.mxu1 %v3735_v37 }
 0x162   :  { %v1640_v32 = vpop.f32.mrf.mxu2 }
 0x163   :  { %v1641_v44 = vadd.f32 %v1640_v32, %v1628_v42  ;;  %2315 = vmatpush.bf16.msra.mxu3 %v3722_v12 }
 0x165   :  { %v1654_v51 = vadd.f32 %v1653_v33, %v1641_v44  ;;  %2324 = vmatpush.bf16.msra.mxu1 %v3734_v55 }
 0x166   :  { %v1655_v43 = vpop.f32.mrf.mxu0 }
 0x167   :  { %v1629_v41 = vpop.f32.mrf.mxu3 }
 0x169   :  { %2325 = vmatpush.bf16.msra.mxu1 %v3733_v13 }
 0x16a   :  { %v1642_v49 = vpop.f32.mrf.mxu2 }
 0x16d   :  { %2326 = vmatpush.bf16.msra.mxu1 %v3732_v16 }
 0x171   :  { %2327 = vmatpush.bf16.msra.mxu1 %v3731_v17 }
 0x172   :  { %v1666_v46 = vpop.f32.mrf.mxu2 }
 0x173   :  { %v1667_v47 = vadd.f32 %v1666_v46, %v1654_v51 }
 0x175   :  { %v1673_v48 = vmax.f32 %v1667_v47, 0.0  ;;  %2328 = vmatpush.bf16.msra.mxu1 %v3730_v19 }
 0x177   :  { %v1677_v57 = vpack.c.bf16 %v1673_v48, %v1673_v48 }
 0x179   :  { %2115 = vmatmul.bf16.vlgmr.msra.gmra.mxu0 %v1677_v57 }
 0x17a   :  { %v1668_v50 = vpop.f32.mrf.mxu2 }
 0x17f   :  { %v2077_v52 = vpop.f32.mrf.mxu3 }
 0x180   :  { %v2078_v56 = vadd.f32 %v2077_v52, %v1744_v54 }
 0x187   :  { %v2079_v53 = vpop.f32.mrf.mxu3 }
 0x189   :  { %2167 = vmatmul.bf16.vlgmr.msrb.gmra.mxu0 %v1677_v57 }
 0x18a   :  { %v2090_v30 = vpop.f32.mrf.mxu1 }
 0x18b   :  { %v2091_v58 = vadd.f32 %v2090_v30, %v2078_v56 }
 0x192   :  { %v2092_v60 = vpop.f32.mrf.mxu1 }
 0x19a   :  { %v2142_v63 = vpop.f32.mrf.mxu1 }
 0x19f   :  { %v2129_v59 = vpop.f32.mrf.mxu3 }
 0x1a0   :  { %v2130_v4 = vadd.f32 %v2129_v59, %v1745_v61 }
 0x1a2   :  { %v2143_v0 = vadd.f32 %v2142_v63, %v2130_v4  ;;  %v2144_v1 = vpop.f32.mrf.mxu1 }
 0x1a7   :  { %v2131_v62 = vpop.f32.mrf.mxu3 }
 0x1cb   :  { %v2103_v8 = vpop.f32.mrf.mxu2 }
 0x1cc   :  { %v2104_v20 = vadd.f32 %v2103_v8, %v2091_v58 }
 0x1d3   :  { %v2105_v11 = vpop.f32.mrf.mxu2 }
 0x1db   :  { %v2155_v15 = vpop.f32.mrf.mxu2 }
 0x1dc   :  { %v2156_v26 = vadd.f32 %v2155_v15, %v2143_v0 }
 0x1e3   :  { %v2157_v18 = vpop.f32.mrf.mxu2 }
 0x1f6   :  { %v2116_v21 = vpop.f32.mrf.mxu0 }
 0x1f7   :  { %v2117_v22 = vadd.f32 %v2116_v21, %v2104_v20 }
 0x1f9   :  { %v2172_v23 = vmax.f32 %v2117_v22, 0.0 }
 0x1fb   :  { %v2174_v24 = vpack.c.bf16 %v2172_v23, %v2172_v23 }
 0x1fd   :  { %2316 = vmatmul.bf16.vlgmr.msra.gmra.mxu3 %v2174_v24 }
 0x1fe   :  { %v2118_v25 = vpop.f32.mrf.mxu0 }
 0x206   :  { %v2168_v28 = vpop.f32.mrf.mxu0 }
 0x207   :  { %v2169_v29 = vadd.f32 %v2168_v28, %v2156_v26 }
 0x209   :  { %v2173_v45 = vmax.f32 %v2169_v29, 0.0 }
 0x20b   :  { %v2175_v31 = vpack.c.bf16 %v2173_v45, %v2173_v45 }
 0x20d   :  { %2329 = vmatmul.bf16.vlgmr.msra.gmra.mxu1 %v2175_v31 }
 0x20e   :  { %v2170_v32 = vpop.f32.mrf.mxu0 }
 0x280   :  { %v2317_v33 = vpop.f32.mrf.mxu3 }
 0x281   :  { %v2318_v38 = vadd.f32 %v3750_v34, %v2317_v33 }
 0x288   :  { %v2319_v36 = vpop.f32.mrf.mxu3 }
 0x28a   :  { %v2330_v40 = vpop.f32.mrf.mxu1 }
 0x28b   :  { %v2331_v14 = vadd.f32 %v2330_v40, %v2318_v38 }
 0x28d   :  { %2334 = vst [vmem:[#allocation11] sm:$0xff] %v2331_v14 }
 0x28e   :  { %2345 = dma.vmem_to_hbm [thread:$0]  %s2341_s8, 128, %s2343_s11, [#allocation4]  }
 0x292   :  { %v2332_v41 = vpop.f32.mrf.mxu1 }
 0x293   :  { %3901 = dma.done.wait [#allocation4], 128  }
 0x294   :  { %3902 = vsyncadd [#allocation4], 4294967168 }
 0x295   :  { %2350 = vsyncpa [#allocation3], 1 }
 0x296   :  { %2351 = vsyncpa [#allocation6], 1 }
 0x297   :  { %2352 = vsyncpa [#allocation9], 1 }
 0x298   :  { %2353 = vsyncpa [#allocation4], 1 }

</bundles_post_ra>
